<compile_context>
chip_gen: v5e
topology: v5e:2x2
jax: 0.10.0
libtpu: 0.0.40
codegen_flags: <defaults>
</compile_context>

<pallas_src>
import math
from functools import partial

import jax
import jax.numpy as jnp
from jax.experimental import pallas as pl
from jax.experimental.pallas import tpu as pltpu

LN_EPS = 1e-5


def _layernorm(x, gamma, beta):
    mu = jnp.mean(x, axis=-1, keepdims=True)
    var = jnp.mean((x - mu) ** 2, axis=-1, keepdims=True)
    return (x - mu) * jax.lax.rsqrt(var + LN_EPS) * gamma + beta


def _softmax_rows(sc):
    sc = sc - jnp.max(sc, axis=-1, keepdims=True)
    p = jnp.exp(sc)
    return p * pl.reciprocal(jnp.sum(p, axis=-1, keepdims=True), approx=True)


def _attention_batched(q, k, v, bt, s, n_head, hd):
    """All heads in one pair of MXU contractions (batch dims = (batch, head))."""
    d = n_head * hd
    q4 = q.astype(jnp.bfloat16).reshape(bt, s, n_head, hd)
    k4 = k.astype(jnp.bfloat16).reshape(bt, s, n_head, hd)
    v4 = v.astype(jnp.bfloat16).reshape(bt, s, n_head, hd)
    sc = jnp.einsum("bqhd,bkhd->bhqk", q4, k4, preferred_element_type=jnp.float32)
    p = _softmax_rows(sc)
    ctx = jnp.einsum("bhqk,bkhd->bqhd", p.astype(jnp.bfloat16), v4,
                     preferred_element_type=jnp.float32)
    return ctx.reshape(bt * s, d)


def _attention_per_head(q, k, v, bt, s, n_head, hd):
    """Fallback: per-head lane slices + 3-D (single batch dim) einsums."""
    d = n_head * hd
    q3 = q.astype(jnp.bfloat16).reshape(bt, s, d)
    k3 = k.astype(jnp.bfloat16).reshape(bt, s, d)
    v3 = v.astype(jnp.bfloat16).reshape(bt, s, d)
    heads = []
    for h in range(n_head):
        sl = slice(h * hd, (h + 1) * hd)
        sc = jnp.einsum("bqd,bkd->bqk", q3[:, :, sl], k3[:, :, sl],
                        preferred_element_type=jnp.float32)
        p = _softmax_rows(sc)
        heads.append(jnp.einsum("bqk,bkd->bqd", p.astype(jnp.bfloat16), v3[:, :, sl],
                                preferred_element_type=jnp.float32))
    return jnp.concatenate(heads, axis=-1).reshape(bt * s, d)


def _encoder_layer_kernel(
    # blocked inputs: (Bt, S, D)
    x_ref, pos_ref,
    # attention params (weights pre-transposed to (in, out), bf16)
    wqk_ref, bqk_ref, wv_ref, bv_ref, wo_ref, bo_ref,
    # FFN params
    w1_ref, b1_ref, w2_ref, b2_ref,
    # LayerNorm params
    g1_ref, be1_ref, g2_ref, be2_ref,
    # output
    out_ref,
    *, n_head, batched_heads,
):
    bt, s, d = x_ref.shape
    hd = d // n_head

    x = x_ref[...].astype(jnp.float32)       # (Bt, S, D)
    pos = pos_ref[...].astype(jnp.float32)   # (Bt, S, D)

    x2 = x.reshape(bt * s, d)                               # rows for all matmuls
    qk_in = (x + pos).reshape(bt * s, d).astype(jnp.bfloat16)

    # Fused Q/K projection: one (Bt*S, D) x (D, 2D) bf16 matmul, f32 accumulate.
    # 1/sqrt(head_dim) has been folded into the Q half by the wrapper.
    qk = jnp.dot(qk_in, wqk_ref[...], preferred_element_type=jnp.float32) + bqk_ref[...]
    v = jnp.dot(x2.astype(jnp.bfloat16), wv_ref[...],
                preferred_element_type=jnp.float32) + bv_ref[...]
    q = qk[:, :d]
    k = qk[:, d:]

    attn = _attention_batched if batched_heads else _attention_per_head
    ctx = attn(q, k, v, bt, s, n_head, hd)                  # (Bt*S, D) f32

    attn_out = jnp.dot(ctx.astype(jnp.bfloat16), wo_ref[...],
                       preferred_element_type=jnp.float32) + bo_ref[...]

    # residual + norm1   (dropout1 == identity)
    y = _layernorm(x2 + attn_out, g1_ref[...], be1_ref[...])

    # FFN: linear1 -> relu -> linear2   (dropout == identity)
    h1 = jnp.dot(y.astype(jnp.bfloat16), w1_ref[...],
                 preferred_element_type=jnp.float32) + b1_ref[...]
    h1 = jnp.maximum(h1, 0.0).astype(jnp.bfloat16)          # bf16 hidden: halves intermediate
    ff = jnp.dot(h1, w2_ref[...], preferred_element_type=jnp.float32) + b2_ref[...]

    # residual + norm2   (dropout2 == identity)
    z = _layernorm(y + ff, g2_ref[...], be2_ref[...])
    out_ref[...] = z.reshape(bt, s, d).astype(out_ref.dtype)


def _vmem_limit_bytes():
    """~80% of this generation's VMEM (v5e/v6e: 128 MiB, v7x: 64 MiB)."""
    try:
        cap = pltpu.get_tpu_info().vmem_capacity_bytes
        return max(32 * 1024 * 1024, int(cap * 0.8))
    except Exception:
        return 64 * 1024 * 1024   # conservative; <= physical on every generation


def _pick_block_b(B, S, D, F, n_head, in_itemsize, budget_bytes, max_rows=4096):
    """Largest batch-tile dividing B whose VMEM working set fits budget_bytes,
    capped so the grid keeps >= 2 steps (both TensorCores on v7x)."""
    act = 4 * S * (14 * D + 2 * F) + 8 * n_head * S * S      # f32 activations + scores
    dma = 2 * 3 * S * D * in_itemsize                        # double-buffered x/pos/out blocks
    per_b = act + dma
    cap = max(1, budget_bytes // max(per_b, 1))
    cap = min(cap, max(1, max_rows // max(S, 1)))            # cap fused MXU M dim
    if B >= 2:
        cap = min(cap, B // 2)                               # >= 2 grid steps
    bt = max(1, min(B, cap))
    while B % bt:
        bt -= 1
    return max(bt, 1)


_CONFIG_CACHE = []   # (batched_heads, single_buffer_params) configs known to lower


def encoder_layer_pallas_bsd(x_bsd, pos_bsd, params, *, n_head, block_b=None,
                             stream_bf16=False, batched_heads=None,
                             single_buffer_params=None):
    """Batch-major fast path: x_bsd, pos_bsd are (B, S, D).  Returns (B, S, D)."""
    B, S, D = x_bsd.shape
    assert D % n_head == 0
    F = params["w1"].shape[0]
    hd = D // n_head
    out_dtype = x_bsd.dtype

    # v5e lever: halve HBM streaming bytes (LN/softmax stats remain f32 in-kernel).
    if stream_bf16:
        x_bsd = x_bsd.astype(jnp.bfloat16)
        pos_bsd = pos_bsd.astype(jnp.bfloat16)

    # Weights pre-transposed to (in, out), bf16 for the MXU.  Softmax scale is
    # folded into the Q half of the fused QK projection (weights and bias).
    scale = 1.0 / math.sqrt(hd)
    wqk = jnp.concatenate([params["wq"].T * scale, params["wk"].T], axis=1).astype(jnp.bfloat16)
    bqk = jnp.concatenate([params["bq"] * scale, params["bk"]]).reshape(1, 2 * D).astype(jnp.float32)
    wv = params["wv"].T.astype(jnp.bfloat16)
    wo = params["wo"].T.astype(jnp.bfloat16)
    w1 = params["w1"].T.astype(jnp.bfloat16)
    w2 = params["w2"].T.astype(jnp.bfloat16)
    bv = params["bv"].reshape(1, D).astype(jnp.float32)
    bo = params["bo"].reshape(1, D).astype(jnp.float32)
    b1 = params["b1"].reshape(1, F).astype(jnp.float32)
    b2 = params["b2"].reshape(1, D).astype(jnp.float32)
    g1 = params["g1"].reshape(1, D).astype(jnp.float32)
    be1 = params["be1"].reshape(1, D).astype(jnp.float32)
    g2 = params["g2"].reshape(1, D).astype(jnp.float32)
    be2 = params["be2"].reshape(1, D).astype(jnp.float32)
    param_args = (wqk, bqk, wv, bv, wo, bo, w1, b1, w2, b2, g1, be1, g2, be2)

    vmem_limit = _vmem_limit_bytes()
    weight_bytes = sum(int(p.size) * p.dtype.itemsize for p in param_args)
    if block_b is None:
        budget = max(4 * 1024 * 1024, int(vmem_limit * 0.35) - 2 * weight_bytes)
        block_b = _pick_block_b(B, S, D, F, n_head, x_bsd.dtype.itemsize, budget)
    assert B % block_b == 0, (B, block_b)
    grid = (B // block_b,)

    blocked = pl.BlockSpec((block_b, S, D), lambda i: (i, 0, 0))

    def param_spec(arr, single_buffer):
        if single_buffer:
            # Constant index_map -> DMA'd once; one buffer halves weight residency.
            return pl.BlockSpec(arr.shape, lambda i: (0, 0), pipeline_mode=pl.Buffered(1))
        return pl.BlockSpec(arr.shape, lambda i: (0, 0))

    # Advisory cost estimate so XLA can schedule around the custom call.
    flops = (2 * B * S * D * (2 * D)        # fused QK proj
             + 2 * B * S * D * D            # V proj
             + 2 * 2 * B * S * S * D        # scores + p@v
             + 2 * B * S * D * D            # out proj
             + 2 * 2 * B * S * D * F)       # FFN
    transcendentals = B * n_head * S * S + B * n_head * S + 2 * B * S
    bytes_accessed = 3 * B * S * D * x_bsd.dtype.itemsize + weight_bytes * grid[0]
    cost = pl.CostEstimate(flops=flops, transcendentals=transcendentals,
                           bytes_accessed=bytes_accessed)

    def run(bh, sb):
        return pl.pallas_call(
            partial(_encoder_layer_kernel, n_head=n_head, batched_heads=bh),
            out_shape=jax.ShapeDtypeStruct((B, S, D), out_dtype),
            grid=grid,
            in_specs=[blocked, blocked] + [param_spec(p, sb) for p in param_args],
            out_specs=blocked,
            compiler_params=pltpu.CompilerParams(
                dimension_semantics=("parallel",),
                vmem_limit_bytes=vmem_limit),
            cost_estimate=cost,
        )(x_bsd, pos_bsd, *param_args)

    bh_opts = [batched_heads] if batched_heads is not None else [True, False]
    sb_opts = [single_buffer_params] if single_buffer_params is not None else [True, False]
    configs = [(bh, sb) for bh in bh_opts for sb in sb_opts]
    for cfg in reversed(_CONFIG_CACHE):          # prefer configs known to lower
        if cfg in configs:
            configs.remove(cfg)
            configs.insert(0, cfg)
    if len(configs) == 1:
        return run(*configs[0])

    last_err = None
    for cfg in configs:
        try:
            out = run(*cfg)
            if cfg not in _CONFIG_CACHE:
                _CONFIG_CACHE.append(cfg)
            return out
        except Exception as e:                   # fall back if a variant fails to lower
            last_err = e
    raise last_err


def encoder_layer_pallas(src_sbd, pos_sbd, params, *, n_head, block_b=None, **kw):
    """Module-contract entry point: src/pos are (S, B, D) (batch_first=False).
    Callers that already hold batch-major (B, S, D) activations should call
    encoder_layer_pallas_bsd directly and skip these two HBM transposes.
    TODO(synk): fold this layout change into the BlockSpec (block dim 1) to
    avoid the two HBM round trips for the (S,B,D) contract as well."""
    x = jnp.transpose(src_sbd, (1, 0, 2))
    pos = jnp.transpose(pos_sbd, (1, 0, 2))
    out = encoder_layer_pallas_bsd(x, pos, params, n_head=n_head, block_b=block_b, **kw)
    return jnp.transpose(out, (1, 0, 2))


def encoder_layer_reference(src_sbd, pos_sbd, params, *, n_head):
    """Pure-JAX f32 reference mirroring PyTorch forward_post (dropout = identity)."""
    S, B, D = src_sbd.shape
    hd = D // n_head

    def ln(x, g, b):
        mu = x.mean(-1, keepdims=True)
        var = ((x - mu) ** 2).mean(-1, keepdims=True)
        return (x - mu) / jnp.sqrt(var + LN_EPS) * g + b

    x = src_sbd
    qk = x + pos_sbd
    q = qk @ params["wq"].T + params["bq"]
    k = qk @ params["wk"].T + params["bk"]
    v = x @ params["wv"].T + params["bv"]

    def split(t):  # (S, B, D) -> (B, H, S, hd)
        return jnp.transpose(t.reshape(S, B, n_head, hd), (1, 2, 0, 3))

    qh, kh, vh = split(q), split(k), split(v)
    s = jnp.einsum("bhqd,bhkd->bhqk", qh, kh) / math.sqrt(hd)
    p = jax.nn.softmax(s, axis=-1)
    ctx = jnp.einsum("bhqk,bhkd->bhqd", p, vh)
    ctx = jnp.transpose(ctx, (2, 0, 1, 3)).reshape(S, B, D)
    attn_out = ctx @ params["wo"].T + params["bo"]

    y = ln(x + attn_out, params["g1"], params["be1"])
    h1 = jnp.maximum(y @ params["w1"].T + params["b1"], 0.0)
    ff = h1 @ params["w2"].T + params["b2"]
    return ln(y + ff, params["g2"], params["be2"])


if __name__ == "__main__":
    S, B, D, H, F = 8, 2, 32, 4, 64  # seq, batch, d_model, n_head, dim_feedforward

    key = jax.random.PRNGKey(0)
    ks = jax.random.split(key, 16)

    def w(k, shape, scale=0.1):
        return scale * jax.random.normal(k, shape, jnp.float32)

    params = {
        # MHA in_proj split into q/k/v (PyTorch layout: (out, in))
        "wq": w(ks[0], (D, D)), "bq": w(ks[1], (D,)),
        "wk": w(ks[2], (D, D)), "bk": w(ks[3], (D,)),
        "wv": w(ks[4], (D, D)), "bv": w(ks[5], (D,)),
        "wo": w(ks[6], (D, D)), "bo": w(ks[7], (D,)),
        # FFN
        "w1": w(ks[8], (F, D)), "b1": w(ks[9], (F,)),
        "w2": w(ks[10], (D, F)), "b2": w(ks[11], (D,)),
        # LayerNorms (PyTorch init: weight=1, bias=0)
        "g1": jnp.ones((D,), jnp.float32), "be1": jnp.zeros((D,), jnp.float32),
        "g2": jnp.ones((D,), jnp.float32), "be2": jnp.zeros((D,), jnp.float32),
    }

    src = jax.random.normal(ks[12], (S, B, D), jnp.float32)
    pos = jax.random.normal(ks[13], (S, B, D), jnp.float32)

    out = encoder_layer_pallas(src, pos, params, n_head=H)
    out = jax.block_until_ready(out)

    ref = encoder_layer_reference(src, pos, params, n_head=H)
    assert out.shape == (S, B, D)
    # Tolerance accounts for bf16 MXU inputs (f32 accumulation) and the
    # EUP approx reciprocal in the softmax; a broken kernel produces O(1) errors.
    err = jnp.max(jnp.abs(out - ref))
    assert jnp.allclose(out, ref, atol=5e-2, rtol=5e-2), f"max abs err {err}"
    print("KERNEL_OK")
</pallas_src>

<mosaic_0001>
module attributes {stable_mosaic.version = 11 : i64} {
  func.func @_encoder_layer_kernel(%arg0: i32, %arg1: memref<1x8x32xf32, #tpu.memory_space<vmem>>, %arg2: memref<1x8x32xf32, #tpu.memory_space<vmem>>, %arg3: memref<32x64xbf16, #tpu.memory_space<vmem>>, %arg4: memref<1x64xf32, #tpu.memory_space<vmem>>, %arg5: memref<32x32xbf16, #tpu.memory_space<vmem>>, %arg6: memref<1x32xf32, #tpu.memory_space<vmem>>, %arg7: memref<32x32xbf16, #tpu.memory_space<vmem>>, %arg8: memref<1x32xf32, #tpu.memory_space<vmem>>, %arg9: memref<32x64xbf16, #tpu.memory_space<vmem>>, %arg10: memref<1x64xf32, #tpu.memory_space<vmem>>, %arg11: memref<64x32xbf16, #tpu.memory_space<vmem>>, %arg12: memref<1x32xf32, #tpu.memory_space<vmem>>, %arg13: memref<1x32xf32, #tpu.memory_space<vmem>>, %arg14: memref<1x32xf32, #tpu.memory_space<vmem>>, %arg15: memref<1x32xf32, #tpu.memory_space<vmem>>, %arg16: memref<1x32xf32, #tpu.memory_space<vmem>>, %arg17: memref<1x8x32xf32, #tpu.memory_space<vmem>>) attributes {dimension_semantics = [#tpu.dimension_semantics<parallel>], iteration_bounds = array<i64: 2>, scalar_prefetch = 0 : i64, scratch_operands = 0 : i64, tpu.core_type = #tpu.core_type<tc>, window_params = [{transform_indices = @transform_0, window_bounds = array<i64: 1, 8, 32>}, {transform_indices = @transform_1, window_bounds = array<i64: 1, 8, 32>}, {pipeline_mode = #tpu.pipeline_mode<synchronous>, transform_indices = @transform_2, window_bounds = array<i64: 32, 64>}, {pipeline_mode = #tpu.pipeline_mode<synchronous>, transform_indices = @transform_3, window_bounds = array<i64: 1, 64>}, {pipeline_mode = #tpu.pipeline_mode<synchronous>, transform_indices = @transform_4, window_bounds = array<i64: 32, 32>}, {pipeline_mode = #tpu.pipeline_mode<synchronous>, transform_indices = @transform_5, window_bounds = array<i64: 1, 32>}, {pipeline_mode = #tpu.pipeline_mode<synchronous>, transform_indices = @transform_6, window_bounds = array<i64: 32, 32>}, {pipeline_mode = #tpu.pipeline_mode<synchronous>, transform_indices = @transform_7, window_bounds = array<i64: 1, 32>}, {pipeline_mode = #tpu.pipeline_mode<synchronous>, transform_indices = @transform_8, window_bounds = array<i64: 32, 64>}, {pipeline_mode = #tpu.pipeline_mode<synchronous>, transform_indices = @transform_9, window_bounds = array<i64: 1, 64>}, {pipeline_mode = #tpu.pipeline_mode<synchronous>, transform_indices = @transform_10, window_bounds = array<i64: 64, 32>}, {pipeline_mode = #tpu.pipeline_mode<synchronous>, transform_indices = @transform_11, window_bounds = array<i64: 1, 32>}, {pipeline_mode = #tpu.pipeline_mode<synchronous>, transform_indices = @transform_12, window_bounds = array<i64: 1, 32>}, {pipeline_mode = #tpu.pipeline_mode<synchronous>, transform_indices = @transform_13, window_bounds = array<i64: 1, 32>}, {pipeline_mode = #tpu.pipeline_mode<synchronous>, transform_indices = @transform_14, window_bounds = array<i64: 1, 32>}, {pipeline_mode = #tpu.pipeline_mode<synchronous>, transform_indices = @transform_15, window_bounds = array<i64: 1, 32>}, {transform_indices = @transform_16, window_bounds = array<i64: 1, 8, 32>}]} {
    %c0 = arith.constant 0 : index
    %c0_0 = arith.constant 0 : index
    %c0_1 = arith.constant 0 : index
    %0 = vector.load %arg1[%c0, %c0_0, %c0_1] : memref<1x8x32xf32, #tpu.memory_space<vmem>>, vector<1x8x32xf32>
    %c0_2 = arith.constant 0 : index
    %c0_3 = arith.constant 0 : index
    %c0_4 = arith.constant 0 : index
    %1 = vector.load %arg2[%c0_2, %c0_3, %c0_4] : memref<1x8x32xf32, #tpu.memory_space<vmem>>, vector<1x8x32xf32>
    %2 = vector.shape_cast %0 : vector<1x8x32xf32> to vector<8x32xf32>
    %3 = arith.addf %0, %1 : vector<1x8x32xf32>
    %4 = vector.shape_cast %3 : vector<1x8x32xf32> to vector<8x32xf32>
    %5 = arith.truncf %4 : vector<8x32xf32> to vector<8x32xbf16>
    %c0_5 = arith.constant 0 : index
    %c0_6 = arith.constant 0 : index
    %6 = vector.load %arg3[%c0_5, %c0_6] : memref<32x64xbf16, #tpu.memory_space<vmem>>, vector<32x64xbf16>
    %cst = arith.constant dense<0.000000e+00> : vector<8x64xf32>
    %7 = tpu.matmul %5, %6, %cst {dimension_numbers = #tpu.dot_dimension_numbers<[1], [0], [0], [1], [0, 0, 1, 1], [], []>} : vector<8x32xbf16>, vector<32x64xbf16>, vector<8x64xf32> -> vector<8x64xf32>
    %c0_7 = arith.constant 0 : index
    %c0_8 = arith.constant 0 : index
    %8 = vector.load %arg4[%c0_7, %c0_8] : memref<1x64xf32, #tpu.memory_space<vmem>>, vector<1x64xf32>
    %9 = vector.broadcast %8 : vector<1x64xf32> to vector<8x64xf32>
    %10 = arith.addf %7, %9 : vector<8x64xf32>
    %11 = arith.truncf %2 : vector<8x32xf32> to vector<8x32xbf16>
    %c0_9 = arith.constant 0 : index
    %c0_10 = arith.constant 0 : index
    %12 = vector.load %arg5[%c0_9, %c0_10] : memref<32x32xbf16, #tpu.memory_space<vmem>>, vector<32x32xbf16>
    %cst_11 = arith.constant dense<0.000000e+00> : vector<8x32xf32>
    %13 = tpu.matmul %11, %12, %cst_11 {dimension_numbers = #tpu.dot_dimension_numbers<[1], [0], [0], [1], [0, 0, 1, 1], [], []>} : vector<8x32xbf16>, vector<32x32xbf16>, vector<8x32xf32> -> vector<8x32xf32>
    %c0_12 = arith.constant 0 : index
    %c0_13 = arith.constant 0 : index
    %14 = vector.load %arg6[%c0_12, %c0_13] : memref<1x32xf32, #tpu.memory_space<vmem>>, vector<1x32xf32>
    %15 = vector.broadcast %14 : vector<1x32xf32> to vector<8x32xf32>
    %16 = arith.addf %13, %15 : vector<8x32xf32>
    %17 = vector.extract_strided_slice %10 {offsets = [0, 0], sizes = [8, 32], strides = [1, 1]} : vector<8x64xf32> to vector<8x32xf32>
    %18 = vector.extract_strided_slice %10 {offsets = [0, 32], sizes = [8, 32], strides = [1, 1]} : vector<8x64xf32> to vector<8x32xf32>
    %19 = arith.truncf %17 : vector<8x32xf32> to vector<8x32xbf16>
    %20 = vector.shape_cast %19 : vector<8x32xbf16> to vector<1x8x32xbf16>
    %21 = arith.truncf %18 : vector<8x32xf32> to vector<8x32xbf16>
    %22 = vector.shape_cast %21 : vector<8x32xbf16> to vector<1x8x32xbf16>
    %23 = arith.truncf %16 : vector<8x32xf32> to vector<8x32xbf16>
    %24 = vector.shape_cast %23 : vector<8x32xbf16> to vector<1x8x32xbf16>
    %25 = vector.extract_strided_slice %20 {offsets = [0, 0, 0], sizes = [1, 8, 8], strides = [1, 1, 1]} : vector<1x8x32xbf16> to vector<1x8x8xbf16>
    %26 = vector.extract_strided_slice %22 {offsets = [0, 0, 0], sizes = [1, 8, 8], strides = [1, 1, 1]} : vector<1x8x32xbf16> to vector<1x8x8xbf16>
    "tpu.trace_start"() <{level = 10 : i32, message = "bqd,bkd->bqk"}> : () -> ()
    %cst_14 = arith.constant dense<0.000000e+00> : vector<1x8x8xf32>
    %27 = tpu.matmul %25, %26, %cst_14 {dimension_numbers = #tpu.dot_dimension_numbers<[2], [2], [1], [1], [0, 0, 0, 1, 1, 1], [0], [0]>} : vector<1x8x8xbf16>, vector<1x8x8xbf16>, vector<1x8x8xf32> -> vector<1x8x8xf32>
    "tpu.trace_stop"() : () -> ()
    %cst_15 = arith.constant dense<0xFF800000> : vector<1x8xf32>
    %28 = vector.multi_reduction <maximumf>, %27, %cst_15 [2] : vector<1x8x8xf32> to vector<1x8xf32>
    %29 = vector.shape_cast %28 : vector<1x8xf32> to vector<1x8x1xf32>
    %30 = vector.broadcast %29 : vector<1x8x1xf32> to vector<1x8x8xf32>
    %31 = arith.subf %27, %30 : vector<1x8x8xf32>
    %32 = math.exp %31 : vector<1x8x8xf32>
    %cst_16 = arith.constant dense<0.000000e+00> : vector<1x8xf32>
    %33 = vector.multi_reduction <add>, %32, %cst_16 [2] : vector<1x8x8xf32> to vector<1x8xf32>
    %34 = vector.shape_cast %33 : vector<1x8xf32> to vector<1x8x1xf32>
    %35 = tpu.reciprocal %34 {approx = true} : vector<1x8x1xf32> -> vector<1x8x1xf32>
    %36 = vector.broadcast %35 : vector<1x8x1xf32> to vector<1x8x8xf32>
    %37 = arith.mulf %32, %36 : vector<1x8x8xf32>
    %38 = arith.truncf %37 : vector<1x8x8xf32> to vector<1x8x8xbf16>
    %39 = vector.extract_strided_slice %24 {offsets = [0, 0, 0], sizes = [1, 8, 8], strides = [1, 1, 1]} : vector<1x8x32xbf16> to vector<1x8x8xbf16>
    "tpu.trace_start"() <{level = 10 : i32, message = "bqk,bkd->bqd"}> : () -> ()
    %cst_17 = arith.constant dense<0.000000e+00> : vector<1x8x8xf32>
    %40 = tpu.matmul %38, %39, %cst_17 {dimension_numbers = #tpu.dot_dimension_numbers<[2], [1], [1], [2], [0, 0, 0, 1, 1, 2], [0], [0]>} : vector<1x8x8xbf16>, vector<1x8x8xbf16>, vector<1x8x8xf32> -> vector<1x8x8xf32>
    "tpu.trace_stop"() : () -> ()
    %41 = vector.extract_strided_slice %20 {offsets = [0, 0, 8], sizes = [1, 8, 8], strides = [1, 1, 1]} : vector<1x8x32xbf16> to vector<1x8x8xbf16>
    %42 = vector.extract_strided_slice %22 {offsets = [0, 0, 8], sizes = [1, 8, 8], strides = [1, 1, 1]} : vector<1x8x32xbf16> to vector<1x8x8xbf16>
    "tpu.trace_start"() <{level = 10 : i32, message = "bqd,bkd->bqk"}> : () -> ()
    %cst_18 = arith.constant dense<0.000000e+00> : vector<1x8x8xf32>
    %43 = tpu.matmul %41, %42, %cst_18 {dimension_numbers = #tpu.dot_dimension_numbers<[2], [2], [1], [1], [0, 0, 0, 1, 1, 1], [0], [0]>} : vector<1x8x8xbf16>, vector<1x8x8xbf16>, vector<1x8x8xf32> -> vector<1x8x8xf32>
    "tpu.trace_stop"() : () -> ()
    %cst_19 = arith.constant dense<0xFF800000> : vector<1x8xf32>
    %44 = vector.multi_reduction <maximumf>, %43, %cst_19 [2] : vector<1x8x8xf32> to vector<1x8xf32>
    %45 = vector.shape_cast %44 : vector<1x8xf32> to vector<1x8x1xf32>
    %46 = vector.broadcast %45 : vector<1x8x1xf32> to vector<1x8x8xf32>
    %47 = arith.subf %43, %46 : vector<1x8x8xf32>
    %48 = math.exp %47 : vector<1x8x8xf32>
    %cst_20 = arith.constant dense<0.000000e+00> : vector<1x8xf32>
    %49 = vector.multi_reduction <add>, %48, %cst_20 [2] : vector<1x8x8xf32> to vector<1x8xf32>
    %50 = vector.shape_cast %49 : vector<1x8xf32> to vector<1x8x1xf32>
    %51 = tpu.reciprocal %50 {approx = true} : vector<1x8x1xf32> -> vector<1x8x1xf32>
    %52 = vector.broadcast %51 : vector<1x8x1xf32> to vector<1x8x8xf32>
    %53 = arith.mulf %48, %52 : vector<1x8x8xf32>
    %54 = arith.truncf %53 : vector<1x8x8xf32> to vector<1x8x8xbf16>
    %55 = vector.extract_strided_slice %24 {offsets = [0, 0, 8], sizes = [1, 8, 8], strides = [1, 1, 1]} : vector<1x8x32xbf16> to vector<1x8x8xbf16>
    "tpu.trace_start"() <{level = 10 : i32, message = "bqk,bkd->bqd"}> : () -> ()
    %cst_21 = arith.constant dense<0.000000e+00> : vector<1x8x8xf32>
    %56 = tpu.matmul %54, %55, %cst_21 {dimension_numbers = #tpu.dot_dimension_numbers<[2], [1], [1], [2], [0, 0, 0, 1, 1, 2], [0], [0]>} : vector<1x8x8xbf16>, vector<1x8x8xbf16>, vector<1x8x8xf32> -> vector<1x8x8xf32>
    "tpu.trace_stop"() : () -> ()
    %57 = vector.extract_strided_slice %20 {offsets = [0, 0, 16], sizes = [1, 8, 8], strides = [1, 1, 1]} : vector<1x8x32xbf16> to vector<1x8x8xbf16>
    %58 = vector.extract_strided_slice %22 {offsets = [0, 0, 16], sizes = [1, 8, 8], strides = [1, 1, 1]} : vector<1x8x32xbf16> to vector<1x8x8xbf16>
    "tpu.trace_start"() <{level = 10 : i32, message = "bqd,bkd->bqk"}> : () -> ()
    %cst_22 = arith.constant dense<0.000000e+00> : vector<1x8x8xf32>
    %59 = tpu.matmul %57, %58, %cst_22 {dimension_numbers = #tpu.dot_dimension_numbers<[2], [2], [1], [1], [0, 0, 0, 1, 1, 1], [0], [0]>} : vector<1x8x8xbf16>, vector<1x8x8xbf16>, vector<1x8x8xf32> -> vector<1x8x8xf32>
    "tpu.trace_stop"() : () -> ()
    %cst_23 = arith.constant dense<0xFF800000> : vector<1x8xf32>
    %60 = vector.multi_reduction <maximumf>, %59, %cst_23 [2] : vector<1x8x8xf32> to vector<1x8xf32>
    %61 = vector.shape_cast %60 : vector<1x8xf32> to vector<1x8x1xf32>
    %62 = vector.broadcast %61 : vector<1x8x1xf32> to vector<1x8x8xf32>
    %63 = arith.subf %59, %62 : vector<1x8x8xf32>
    %64 = math.exp %63 : vector<1x8x8xf32>
    %cst_24 = arith.constant dense<0.000000e+00> : vector<1x8xf32>
    %65 = vector.multi_reduction <add>, %64, %cst_24 [2] : vector<1x8x8xf32> to vector<1x8xf32>
    %66 = vector.shape_cast %65 : vector<1x8xf32> to vector<1x8x1xf32>
    %67 = tpu.reciprocal %66 {approx = true} : vector<1x8x1xf32> -> vector<1x8x1xf32>
    %68 = vector.broadcast %67 : vector<1x8x1xf32> to vector<1x8x8xf32>
    %69 = arith.mulf %64, %68 : vector<1x8x8xf32>
    %70 = arith.truncf %69 : vector<1x8x8xf32> to vector<1x8x8xbf16>
    %71 = vector.extract_strided_slice %24 {offsets = [0, 0, 16], sizes = [1, 8, 8], strides = [1, 1, 1]} : vector<1x8x32xbf16> to vector<1x8x8xbf16>
    "tpu.trace_start"() <{level = 10 : i32, message = "bqk,bkd->bqd"}> : () -> ()
    %cst_25 = arith.constant dense<0.000000e+00> : vector<1x8x8xf32>
    %72 = tpu.matmul %70, %71, %cst_25 {dimension_numbers = #tpu.dot_dimension_numbers<[2], [1], [1], [2], [0, 0, 0, 1, 1, 2], [0], [0]>} : vector<1x8x8xbf16>, vector<1x8x8xbf16>, vector<1x8x8xf32> -> vector<1x8x8xf32>
    "tpu.trace_stop"() : () -> ()
    %73 = vector.extract_strided_slice %20 {offsets = [0, 0, 24], sizes = [1, 8, 8], strides = [1, 1, 1]} : vector<1x8x32xbf16> to vector<1x8x8xbf16>
    %74 = vector.extract_strided_slice %22 {offsets = [0, 0, 24], sizes = [1, 8, 8], strides = [1, 1, 1]} : vector<1x8x32xbf16> to vector<1x8x8xbf16>
    "tpu.trace_start"() <{level = 10 : i32, message = "bqd,bkd->bqk"}> : () -> ()
    %cst_26 = arith.constant dense<0.000000e+00> : vector<1x8x8xf32>
    %75 = tpu.matmul %73, %74, %cst_26 {dimension_numbers = #tpu.dot_dimension_numbers<[2], [2], [1], [1], [0, 0, 0, 1, 1, 1], [0], [0]>} : vector<1x8x8xbf16>, vector<1x8x8xbf16>, vector<1x8x8xf32> -> vector<1x8x8xf32>
    "tpu.trace_stop"() : () -> ()
    %cst_27 = arith.constant dense<0xFF800000> : vector<1x8xf32>
    %76 = vector.multi_reduction <maximumf>, %75, %cst_27 [2] : vector<1x8x8xf32> to vector<1x8xf32>
    %77 = vector.shape_cast %76 : vector<1x8xf32> to vector<1x8x1xf32>
    %78 = vector.broadcast %77 : vector<1x8x1xf32> to vector<1x8x8xf32>
    %79 = arith.subf %75, %78 : vector<1x8x8xf32>
    %80 = math.exp %79 : vector<1x8x8xf32>
    %cst_28 = arith.constant dense<0.000000e+00> : vector<1x8xf32>
    %81 = vector.multi_reduction <add>, %80, %cst_28 [2] : vector<1x8x8xf32> to vector<1x8xf32>
    %82 = vector.shape_cast %81 : vector<1x8xf32> to vector<1x8x1xf32>
    %83 = tpu.reciprocal %82 {approx = true} : vector<1x8x1xf32> -> vector<1x8x1xf32>
    %84 = vector.broadcast %83 : vector<1x8x1xf32> to vector<1x8x8xf32>
    %85 = arith.mulf %80, %84 : vector<1x8x8xf32>
    %86 = arith.truncf %85 : vector<1x8x8xf32> to vector<1x8x8xbf16>
    %87 = vector.extract_strided_slice %24 {offsets = [0, 0, 24], sizes = [1, 8, 8], strides = [1, 1, 1]} : vector<1x8x32xbf16> to vector<1x8x8xbf16>
    "tpu.trace_start"() <{level = 10 : i32, message = "bqk,bkd->bqd"}> : () -> ()
    %cst_29 = arith.constant dense<0.000000e+00> : vector<1x8x8xf32>
    %88 = tpu.matmul %86, %87, %cst_29 {dimension_numbers = #tpu.dot_dimension_numbers<[2], [1], [1], [2], [0, 0, 0, 1, 1, 2], [0], [0]>} : vector<1x8x8xbf16>, vector<1x8x8xbf16>, vector<1x8x8xf32> -> vector<1x8x8xf32>
    "tpu.trace_stop"() : () -> ()
    %89 = tpu.concatenate %40, %56, %72, %88 in 2 : vector<1x8x8xf32>, vector<1x8x8xf32>, vector<1x8x8xf32>, vector<1x8x8xf32> -> vector<1x8x32xf32>
    %90 = vector.shape_cast %89 : vector<1x8x32xf32> to vector<8x32xf32>
    %91 = arith.truncf %90 : vector<8x32xf32> to vector<8x32xbf16>
    %c0_30 = arith.constant 0 : index
    %c0_31 = arith.constant 0 : index
    %92 = vector.load %arg7[%c0_30, %c0_31] : memref<32x32xbf16, #tpu.memory_space<vmem>>, vector<32x32xbf16>
    %cst_32 = arith.constant dense<0.000000e+00> : vector<8x32xf32>
    %93 = tpu.matmul %91, %92, %cst_32 {dimension_numbers = #tpu.dot_dimension_numbers<[1], [0], [0], [1], [0, 0, 1, 1], [], []>} : vector<8x32xbf16>, vector<32x32xbf16>, vector<8x32xf32> -> vector<8x32xf32>
    %c0_33 = arith.constant 0 : index
    %c0_34 = arith.constant 0 : index
    %94 = vector.load %arg8[%c0_33, %c0_34] : memref<1x32xf32, #tpu.memory_space<vmem>>, vector<1x32xf32>
    %95 = vector.broadcast %94 : vector<1x32xf32> to vector<8x32xf32>
    %96 = arith.addf %93, %95 : vector<8x32xf32>
    %97 = arith.addf %2, %96 : vector<8x32xf32>
    %c0_35 = arith.constant 0 : index
    %c0_36 = arith.constant 0 : index
    %98 = vector.load %arg13[%c0_35, %c0_36] : memref<1x32xf32, #tpu.memory_space<vmem>>, vector<1x32xf32>
    %c0_37 = arith.constant 0 : index
    %c0_38 = arith.constant 0 : index
    %99 = vector.load %arg14[%c0_37, %c0_38] : memref<1x32xf32, #tpu.memory_space<vmem>>, vector<1x32xf32>
    %cst_39 = arith.constant dense<0.000000e+00> : vector<8xf32>
    %100 = vector.multi_reduction <add>, %97, %cst_39 [1] : vector<8x32xf32> to vector<8xf32>
    %101 = vector.shape_cast %100 : vector<8xf32> to vector<8x1xf32>
    %cst_40 = arith.constant 3.200000e+01 : f32
    %102 = vector.broadcast %cst_40 : f32 to vector<8x1xf32>
    %103 = arith.divf %101, %102 : vector<8x1xf32>
    %104 = vector.broadcast %103 : vector<8x1xf32> to vector<8x32xf32>
    %105 = arith.subf %97, %104 : vector<8x32xf32>
    %106 = arith.mulf %105, %105 : vector<8x32xf32>
    %cst_41 = arith.constant dense<0.000000e+00> : vector<8xf32>
    %107 = vector.multi_reduction <add>, %106, %cst_41 [1] : vector<8x32xf32> to vector<8xf32>
    %108 = vector.shape_cast %107 : vector<8xf32> to vector<8x1xf32>
    %cst_42 = arith.constant 3.200000e+01 : f32
    %109 = vector.broadcast %cst_42 : f32 to vector<8x1xf32>
    %110 = arith.divf %108, %109 : vector<8x1xf32>
    %111 = vector.broadcast %103 : vector<8x1xf32> to vector<8x32xf32>
    %112 = arith.subf %97, %111 : vector<8x32xf32>
    %cst_43 = arith.constant 9.99999974E-6 : f32
    %113 = vector.broadcast %cst_43 : f32 to vector<8x1xf32>
    %114 = arith.addf %110, %113 : vector<8x1xf32>
    %115 = math.rsqrt %114 : vector<8x1xf32>
    %116 = vector.broadcast %115 : vector<8x1xf32> to vector<8x32xf32>
    %117 = arith.mulf %112, %116 : vector<8x32xf32>
    %118 = vector.broadcast %98 : vector<1x32xf32> to vector<8x32xf32>
    %119 = arith.mulf %117, %118 : vector<8x32xf32>
    %120 = vector.broadcast %99 : vector<1x32xf32> to vector<8x32xf32>
    %121 = arith.addf %119, %120 : vector<8x32xf32>
    %122 = arith.truncf %121 : vector<8x32xf32> to vector<8x32xbf16>
    %c0_44 = arith.constant 0 : index
    %c0_45 = arith.constant 0 : index
    %123 = vector.load %arg9[%c0_44, %c0_45] : memref<32x64xbf16, #tpu.memory_space<vmem>>, vector<32x64xbf16>
    %cst_46 = arith.constant dense<0.000000e+00> : vector<8x64xf32>
    %124 = tpu.matmul %122, %123, %cst_46 {dimension_numbers = #tpu.dot_dimension_numbers<[1], [0], [0], [1], [0, 0, 1, 1], [], []>} : vector<8x32xbf16>, vector<32x64xbf16>, vector<8x64xf32> -> vector<8x64xf32>
    %c0_47 = arith.constant 0 : index
    %c0_48 = arith.constant 0 : index
    %125 = vector.load %arg10[%c0_47, %c0_48] : memref<1x64xf32, #tpu.memory_space<vmem>>, vector<1x64xf32>
    %126 = vector.broadcast %125 : vector<1x64xf32> to vector<8x64xf32>
    %127 = arith.addf %124, %126 : vector<8x64xf32>
    %cst_49 = arith.constant 0.000000e+00 : f32
    %128 = vector.broadcast %cst_49 : f32 to vector<8x64xf32>
    %129 = arith.maximumf %127, %128 : vector<8x64xf32>
    %130 = arith.truncf %129 : vector<8x64xf32> to vector<8x64xbf16>
    %c0_50 = arith.constant 0 : index
    %c0_51 = arith.constant 0 : index
    %131 = vector.load %arg11[%c0_50, %c0_51] : memref<64x32xbf16, #tpu.memory_space<vmem>>, vector<64x32xbf16>
    %cst_52 = arith.constant dense<0.000000e+00> : vector<8x32xf32>
    %132 = tpu.matmul %130, %131, %cst_52 {dimension_numbers = #tpu.dot_dimension_numbers<[1], [0], [0], [1], [0, 0, 1, 1], [], []>} : vector<8x64xbf16>, vector<64x32xbf16>, vector<8x32xf32> -> vector<8x32xf32>
    %c0_53 = arith.constant 0 : index
    %c0_54 = arith.constant 0 : index
    %133 = vector.load %arg12[%c0_53, %c0_54] : memref<1x32xf32, #tpu.memory_space<vmem>>, vector<1x32xf32>
    %134 = vector.broadcast %133 : vector<1x32xf32> to vector<8x32xf32>
    %135 = arith.addf %132, %134 : vector<8x32xf32>
    %136 = arith.addf %121, %135 : vector<8x32xf32>
    %c0_55 = arith.constant 0 : index
    %c0_56 = arith.constant 0 : index
    %137 = vector.load %arg15[%c0_55, %c0_56] : memref<1x32xf32, #tpu.memory_space<vmem>>, vector<1x32xf32>
    %c0_57 = arith.constant 0 : index
    %c0_58 = arith.constant 0 : index
    %138 = vector.load %arg16[%c0_57, %c0_58] : memref<1x32xf32, #tpu.memory_space<vmem>>, vector<1x32xf32>
    %cst_59 = arith.constant dense<0.000000e+00> : vector<8xf32>
    %139 = vector.multi_reduction <add>, %136, %cst_59 [1] : vector<8x32xf32> to vector<8xf32>
    %140 = vector.shape_cast %139 : vector<8xf32> to vector<8x1xf32>
    %cst_60 = arith.constant 3.200000e+01 : f32
    %141 = vector.broadcast %cst_60 : f32 to vector<8x1xf32>
    %142 = arith.divf %140, %141 : vector<8x1xf32>
    %143 = vector.broadcast %142 : vector<8x1xf32> to vector<8x32xf32>
    %144 = arith.subf %136, %143 : vector<8x32xf32>
    %145 = arith.mulf %144, %144 : vector<8x32xf32>
    %cst_61 = arith.constant dense<0.000000e+00> : vector<8xf32>
    %146 = vector.multi_reduction <add>, %145, %cst_61 [1] : vector<8x32xf32> to vector<8xf32>
    %147 = vector.shape_cast %146 : vector<8xf32> to vector<8x1xf32>
    %cst_62 = arith.constant 3.200000e+01 : f32
    %148 = vector.broadcast %cst_62 : f32 to vector<8x1xf32>
    %149 = arith.divf %147, %148 : vector<8x1xf32>
    %150 = vector.broadcast %142 : vector<8x1xf32> to vector<8x32xf32>
    %151 = arith.subf %136, %150 : vector<8x32xf32>
    %cst_63 = arith.constant 9.99999974E-6 : f32
    %152 = vector.broadcast %cst_63 : f32 to vector<8x1xf32>
    %153 = arith.addf %149, %152 : vector<8x1xf32>
    %154 = math.rsqrt %153 : vector<8x1xf32>
    %155 = vector.broadcast %154 : vector<8x1xf32> to vector<8x32xf32>
    %156 = arith.mulf %151, %155 : vector<8x32xf32>
    %157 = vector.broadcast %137 : vector<1x32xf32> to vector<8x32xf32>
    %158 = arith.mulf %156, %157 : vector<8x32xf32>
    %159 = vector.broadcast %138 : vector<1x32xf32> to vector<8x32xf32>
    %160 = arith.addf %158, %159 : vector<8x32xf32>
    %161 = vector.shape_cast %160 : vector<8x32xf32> to vector<1x8x32xf32>
    %c0_64 = arith.constant 0 : index
    %c0_65 = arith.constant 0 : index
    %c0_66 = arith.constant 0 : index
    %162 = vector.load %arg17[%c0_64, %c0_65, %c0_66] : memref<1x8x32xf32, #tpu.memory_space<vmem>>, vector<1x8x32xf32>
    tpu.vector_store %arg17[%c0_64, %c0_65, %c0_66], %161 {strides = array<i32>} : memref<1x8x32xf32, #tpu.memory_space<vmem>>, vector<1x8x32xf32>,
    return
  }
  func.func @transform_0(%arg0: i32) -> (i32, i32, i32) {
    %c0_i32 = arith.constant 0 : i32
    %c0_i32_0 = arith.constant 0 : i32
    %c0_i32_1 = arith.constant 0 : i32
    return %arg0, %c0_i32, %c0_i32_0 : i32, i32, i32
  }
  func.func @transform_1(%arg0: i32) -> (i32, i32, i32) {
    %c0_i32 = arith.constant 0 : i32
    %c0_i32_0 = arith.constant 0 : i32
    %c0_i32_1 = arith.constant 0 : i32
    return %arg0, %c0_i32, %c0_i32_0 : i32, i32, i32
  }
  func.func @transform_2(%arg0: i32) -> (i32, i32) {
    %c0_i32 = arith.constant 0 : i32
    %c0_i32_0 = arith.constant 0 : i32
    %c0_i32_1 = arith.constant 0 : i32
    return %c0_i32, %c0_i32_0 : i32, i32
  }
  func.func @transform_3(%arg0: i32) -> (i32, i32) {
    %c0_i32 = arith.constant 0 : i32
    %c0_i32_0 = arith.constant 0 : i32
    %c0_i32_1 = arith.constant 0 : i32
    return %c0_i32, %c0_i32_0 : i32, i32
  }
  func.func @transform_4(%arg0: i32) -> (i32, i32) {
    %c0_i32 = arith.constant 0 : i32
    %c0_i32_0 = arith.constant 0 : i32
    %c0_i32_1 = arith.constant 0 : i32
    return %c0_i32, %c0_i32_0 : i32, i32
  }
  func.func @transform_5(%arg0: i32) -> (i32, i32) {
    %c0_i32 = arith.constant 0 : i32
    %c0_i32_0 = arith.constant 0 : i32
    %c0_i32_1 = arith.constant 0 : i32
    return %c0_i32, %c0_i32_0 : i32, i32
  }
  func.func @transform_6(%arg0: i32) -> (i32, i32) {
    %c0_i32 = arith.constant 0 : i32
    %c0_i32_0 = arith.constant 0 : i32
    %c0_i32_1 = arith.constant 0 : i32
    return %c0_i32, %c0_i32_0 : i32, i32
  }
  func.func @transform_7(%arg0: i32) -> (i32, i32) {
    %c0_i32 = arith.constant 0 : i32
    %c0_i32_0 = arith.constant 0 : i32
    %c0_i32_1 = arith.constant 0 : i32
    return %c0_i32, %c0_i32_0 : i32, i32
  }
  func.func @transform_8(%arg0: i32) -> (i32, i32) {
    %c0_i32 = arith.constant 0 : i32
    %c0_i32_0 = arith.constant 0 : i32
    %c0_i32_1 = arith.constant 0 : i32
    return %c0_i32, %c0_i32_0 : i32, i32
  }
  func.func @transform_9(%arg0: i32) -> (i32, i32) {
    %c0_i32 = arith.constant 0 : i32
    %c0_i32_0 = arith.constant 0 : i32
    %c0_i32_1 = arith.constant 0 : i32
    return %c0_i32, %c0_i32_0 : i32, i32
  }
  func.func @transform_10(%arg0: i32) -> (i32, i32) {
    %c0_i32 = arith.constant 0 : i32
    %c0_i32_0 = arith.constant 0 : i32
    %c0_i32_1 = arith.constant 0 : i32
    return %c0_i32, %c0_i32_0 : i32, i32
  }
  func.func @transform_11(%arg0: i32) -> (i32, i32) {
    %c0_i32 = arith.constant 0 : i32
    %c0_i32_0 = arith.constant 0 : i32
    %c0_i32_1 = arith.constant 0 : i32
    return %c0_i32, %c0_i32_0 : i32, i32
  }
  func.func @transform_12(%arg0: i32) -> (i32, i32) {
    %c0_i32 = arith.constant 0 : i32
    %c0_i32_0 = arith.constant 0 : i32
    %c0_i32_1 = arith.constant 0 : i32
    return %c0_i32, %c0_i32_0 : i32, i32
  }
  func.func @transform_13(%arg0: i32) -> (i32, i32) {
    %c0_i32 = arith.constant 0 : i32
    %c0_i32_0 = arith.constant 0 : i32
    %c0_i32_1 = arith.constant 0 : i32
    return %c0_i32, %c0_i32_0 : i32, i32
  }
  func.func @transform_14(%arg0: i32) -> (i32, i32) {
    %c0_i32 = arith.constant 0 : i32
    %c0_i32_0 = arith.constant 0 : i32
    %c0_i32_1 = arith.constant 0 : i32
    return %c0_i32, %c0_i32_0 : i32, i32
  }
  func.func @transform_15(%arg0: i32) -> (i32, i32) {
    %c0_i32 = arith.constant 0 : i32
    %c0_i32_0 = arith.constant 0 : i32
    %c0_i32_1 = arith.constant 0 : i32
    return %c0_i32, %c0_i32_0 : i32, i32
  }
  func.func @transform_16(%arg0: i32) -> (i32, i32, i32) {
    %c0_i32 = arith.constant 0 : i32
    %c0_i32_0 = arith.constant 0 : i32
    %c0_i32_1 = arith.constant 0 : i32
    return %arg0, %c0_i32, %c0_i32_0 : i32, i32, i32
  }
}

module attributes {stable_mosaic.version = 11 : i64} {
  func.func @_encoder_layer_kernel(%arg0: i32, %arg1: memref<1x8x32xf32, #tpu.memory_space<vmem>>, %arg2: memref<1x8x32xf32, #tpu.memory_space<vmem>>, %arg3: memref<32x64xbf16, #tpu.memory_space<vmem>>, %arg4: memref<1x64xf32, #tpu.memory_space<vmem>>, %arg5: memref<32x32xbf16, #tpu.memory_space<vmem>>, %arg6: memref<1x32xf32, #tpu.memory_space<vmem>>, %arg7: memref<32x32xbf16, #tpu.memory_space<vmem>>, %arg8: memref<1x32xf32, #tpu.memory_space<vmem>>, %arg9: memref<32x64xbf16, #tpu.memory_space<vmem>>, %arg10: memref<1x64xf32, #tpu.memory_space<vmem>>, %arg11: memref<64x32xbf16, #tpu.memory_space<vmem>>, %arg12: memref<1x32xf32, #tpu.memory_space<vmem>>, %arg13: memref<1x32xf32, #tpu.memory_space<vmem>>, %arg14: memref<1x32xf32, #tpu.memory_space<vmem>>, %arg15: memref<1x32xf32, #tpu.memory_space<vmem>>, %arg16: memref<1x32xf32, #tpu.memory_space<vmem>>, %arg17: memref<1x8x32xf32, #tpu.memory_space<vmem>>) attributes {dimension_semantics = [#tpu.dimension_semantics<parallel>], iteration_bounds = array<i64: 2>, scalar_prefetch = 0 : i64, scratch_operands = 0 : i64, tpu.core_type = #tpu.core_type<tc>, window_params = [{transform_indices = @transform_0, window_bounds = array<i64: 1, 8, 32>}, {transform_indices = @transform_1, window_bounds = array<i64: 1, 8, 32>}, {pipeline_mode = #tpu.pipeline_mode<synchronous>, transform_indices = @transform_2, window_bounds = array<i64: 32, 64>}, {pipeline_mode = #tpu.pipeline_mode<synchronous>, transform_indices = @transform_3, window_bounds = array<i64: 1, 64>}, {pipeline_mode = #tpu.pipeline_mode<synchronous>, transform_indices = @transform_4, window_bounds = array<i64: 32, 32>}, {pipeline_mode = #tpu.pipeline_mode<synchronous>, transform_indices = @transform_5, window_bounds = array<i64: 1, 32>}, {pipeline_mode = #tpu.pipeline_mode<synchronous>, transform_indices = @transform_6, window_bounds = array<i64: 32, 32>}, {pipeline_mode = #tpu.pipeline_mode<synchronous>, transform_indices = @transform_7, window_bounds = array<i64: 1, 32>}, {pipeline_mode = #tpu.pipeline_mode<synchronous>, transform_indices = @transform_8, window_bounds = array<i64: 32, 64>}, {pipeline_mode = #tpu.pipeline_mode<synchronous>, transform_indices = @transform_9, window_bounds = array<i64: 1, 64>}, {pipeline_mode = #tpu.pipeline_mode<synchronous>, transform_indices = @transform_10, window_bounds = array<i64: 64, 32>}, {pipeline_mode = #tpu.pipeline_mode<synchronous>, transform_indices = @transform_11, window_bounds = array<i64: 1, 32>}, {pipeline_mode = #tpu.pipeline_mode<synchronous>, transform_indices = @transform_12, window_bounds = array<i64: 1, 32>}, {pipeline_mode = #tpu.pipeline_mode<synchronous>, transform_indices = @transform_13, window_bounds = array<i64: 1, 32>}, {pipeline_mode = #tpu.pipeline_mode<synchronous>, transform_indices = @transform_14, window_bounds = array<i64: 1, 32>}, {pipeline_mode = #tpu.pipeline_mode<synchronous>, transform_indices = @transform_15, window_bounds = array<i64: 1, 32>}, {transform_indices = @transform_16, window_bounds = array<i64: 1, 8, 32>}]} {
    %c0 = arith.constant 0 : index
    %c0_0 = arith.constant 0 : index
    %c0_1 = arith.constant 0 : index
    %0 = vector.load %arg1[%c0, %c0_0, %c0_1] : memref<1x8x32xf32, #tpu.memory_space<vmem>>, vector<1x8x32xf32>
    %c0_2 = arith.constant 0 : index
    %c0_3 = arith.constant 0 : index
    %c0_4 = arith.constant 0 : index
    %1 = vector.load %arg2[%c0_2, %c0_3, %c0_4] : memref<1x8x32xf32, #tpu.memory_space<vmem>>, vector<1x8x32xf32>
    %2 = vector.shape_cast %0 : vector<1x8x32xf32> to vector<8x32xf32>
    %3 = arith.addf %0, %1 : vector<1x8x32xf32>
    %4 = vector.shape_cast %3 : vector<1x8x32xf32> to vector<8x32xf32>
    %5 = arith.truncf %4 : vector<8x32xf32> to vector<8x32xbf16>
    %c0_5 = arith.constant 0 : index
    %c0_6 = arith.constant 0 : index
    %6 = vector.load %arg3[%c0_5, %c0_6] : memref<32x64xbf16, #tpu.memory_space<vmem>>, vector<32x64xbf16>
    %cst = arith.constant dense<0.000000e+00> : vector<8x64xf32>
    %7 = tpu.matmul %5, %6, %cst {dimension_numbers = #tpu.dot_dimension_numbers<[1], [0], [0], [1], [0, 0, 1, 1], [], []>} : vector<8x32xbf16>, vector<32x64xbf16>, vector<8x64xf32> -> vector<8x64xf32>
    %c0_7 = arith.constant 0 : index
    %c0_8 = arith.constant 0 : index
    %8 = vector.load %arg4[%c0_7, %c0_8] : memref<1x64xf32, #tpu.memory_space<vmem>>, vector<1x64xf32>
    %9 = vector.broadcast %8 : vector<1x64xf32> to vector<8x64xf32>
    %10 = arith.addf %7, %9 : vector<8x64xf32>
    %11 = arith.truncf %2 : vector<8x32xf32> to vector<8x32xbf16>
    %c0_9 = arith.constant 0 : index
    %c0_10 = arith.constant 0 : index
    %12 = vector.load %arg5[%c0_9, %c0_10] : memref<32x32xbf16, #tpu.memory_space<vmem>>, vector<32x32xbf16>
    %cst_11 = arith.constant dense<0.000000e+00> : vector<8x32xf32>
    %13 = tpu.matmul %11, %12, %cst_11 {dimension_numbers = #tpu.dot_dimension_numbers<[1], [0], [0], [1], [0, 0, 1, 1], [], []>} : vector<8x32xbf16>, vector<32x32xbf16>, vector<8x32xf32> -> vector<8x32xf32>
    %c0_12 = arith.constant 0 : index
    %c0_13 = arith.constant 0 : index
    %14 = vector.load %arg6[%c0_12, %c0_13] : memref<1x32xf32, #tpu.memory_space<vmem>>, vector<1x32xf32>
    %15 = vector.broadcast %14 : vector<1x32xf32> to vector<8x32xf32>
    %16 = arith.addf %13, %15 : vector<8x32xf32>
    %17 = vector.extract_strided_slice %10 {offsets = [0, 0], sizes = [8, 32], strides = [1, 1]} : vector<8x64xf32> to vector<8x32xf32>
    %18 = vector.extract_strided_slice %10 {offsets = [0, 32], sizes = [8, 32], strides = [1, 1]} : vector<8x64xf32> to vector<8x32xf32>
    %19 = arith.truncf %17 : vector<8x32xf32> to vector<8x32xbf16>
    %20 = vector.shape_cast %19 : vector<8x32xbf16> to vector<1x8x32xbf16>
    %21 = arith.truncf %18 : vector<8x32xf32> to vector<8x32xbf16>
    %22 = vector.shape_cast %21 : vector<8x32xbf16> to vector<1x8x32xbf16>
    %23 = arith.truncf %16 : vector<8x32xf32> to vector<8x32xbf16>
    %24 = vector.shape_cast %23 : vector<8x32xbf16> to vector<1x8x32xbf16>
    %25 = vector.extract_strided_slice %20 {offsets = [0, 0, 0], sizes = [1, 8, 8], strides = [1, 1, 1]} : vector<1x8x32xbf16> to vector<1x8x8xbf16>
    %26 = vector.extract_strided_slice %22 {offsets = [0, 0, 0], sizes = [1, 8, 8], strides = [1, 1, 1]} : vector<1x8x32xbf16> to vector<1x8x8xbf16>
    "tpu.trace_start"() <{level = 10 : i32, message = "bqd,bkd->bqk"}> : () -> ()
    %cst_14 = arith.constant dense<0.000000e+00> : vector<1x8x8xf32>
    %27 = tpu.matmul %25, %26, %cst_14 {dimension_numbers = #tpu.dot_dimension_numbers<[2], [2], [1], [1], [0, 0, 0, 1, 1, 1], [0], [0]>} : vector<1x8x8xbf16>, vector<1x8x8xbf16>, vector<1x8x8xf32> -> vector<1x8x8xf32>
    "tpu.trace_stop"() : () -> ()
    %cst_15 = arith.constant dense<0xFF800000> : vector<1x8xf32>
    %28 = vector.multi_reduction <maximumf>, %27, %cst_15 [2] : vector<1x8x8xf32> to vector<1x8xf32>
    %29 = vector.shape_cast %28 : vector<1x8xf32> to vector<1x8x1xf32>
    %30 = vector.broadcast %29 : vector<1x8x1xf32> to vector<1x8x8xf32>
    %31 = arith.subf %27, %30 : vector<1x8x8xf32>
    %32 = math.exp %31 : vector<1x8x8xf32>
    %cst_16 = arith.constant dense<0.000000e+00> : vector<1x8xf32>
    %33 = vector.multi_reduction <add>, %32, %cst_16 [2] : vector<1x8x8xf32> to vector<1x8xf32>
    %34 = vector.shape_cast %33 : vector<1x8xf32> to vector<1x8x1xf32>
    %35 = tpu.reciprocal %34 {approx = true} : vector<1x8x1xf32> -> vector<1x8x1xf32>
    %36 = vector.broadcast %35 : vector<1x8x1xf32> to vector<1x8x8xf32>
    %37 = arith.mulf %32, %36 : vector<1x8x8xf32>
    %38 = arith.truncf %37 : vector<1x8x8xf32> to vector<1x8x8xbf16>
    %39 = vector.extract_strided_slice %24 {offsets = [0, 0, 0], sizes = [1, 8, 8], strides = [1, 1, 1]} : vector<1x8x32xbf16> to vector<1x8x8xbf16>
    "tpu.trace_start"() <{level = 10 : i32, message = "bqk,bkd->bqd"}> : () -> ()
    %cst_17 = arith.constant dense<0.000000e+00> : vector<1x8x8xf32>
    %40 = tpu.matmul %38, %39, %cst_17 {dimension_numbers = #tpu.dot_dimension_numbers<[2], [1], [1], [2], [0, 0, 0, 1, 1, 2], [0], [0]>} : vector<1x8x8xbf16>, vector<1x8x8xbf16>, vector<1x8x8xf32> -> vector<1x8x8xf32>
    "tpu.trace_stop"() : () -> ()
    %41 = vector.extract_strided_slice %20 {offsets = [0, 0, 8], sizes = [1, 8, 8], strides = [1, 1, 1]} : vector<1x8x32xbf16> to vector<1x8x8xbf16>
    %42 = vector.extract_strided_slice %22 {offsets = [0, 0, 8], sizes = [1, 8, 8], strides = [1, 1, 1]} : vector<1x8x32xbf16> to vector<1x8x8xbf16>
    "tpu.trace_start"() <{level = 10 : i32, message = "bqd,bkd->bqk"}> : () -> ()
    %cst_18 = arith.constant dense<0.000000e+00> : vector<1x8x8xf32>
    %43 = tpu.matmul %41, %42, %cst_18 {dimension_numbers = #tpu.dot_dimension_numbers<[2], [2], [1], [1], [0, 0, 0, 1, 1, 1], [0], [0]>} : vector<1x8x8xbf16>, vector<1x8x8xbf16>, vector<1x8x8xf32> -> vector<1x8x8xf32>
    "tpu.trace_stop"() : () -> ()
    %cst_19 = arith.constant dense<0xFF800000> : vector<1x8xf32>
    %44 = vector.multi_reduction <maximumf>, %43, %cst_19 [2] : vector<1x8x8xf32> to vector<1x8xf32>
    %45 = vector.shape_cast %44 : vector<1x8xf32> to vector<1x8x1xf32>
    %46 = vector.broadcast %45 : vector<1x8x1xf32> to vector<1x8x8xf32>
    %47 = arith.subf %43, %46 : vector<1x8x8xf32>
    %48 = math.exp %47 : vector<1x8x8xf32>
    %cst_20 = arith.constant dense<0.000000e+00> : vector<1x8xf32>
    %49 = vector.multi_reduction <add>, %48, %cst_20 [2] : vector<1x8x8xf32> to vector<1x8xf32>
    %50 = vector.shape_cast %49 : vector<1x8xf32> to vector<1x8x1xf32>
    %51 = tpu.reciprocal %50 {approx = true} : vector<1x8x1xf32> -> vector<1x8x1xf32>
    %52 = vector.broadcast %51 : vector<1x8x1xf32> to vector<1x8x8xf32>
    %53 = arith.mulf %48, %52 : vector<1x8x8xf32>
    %54 = arith.truncf %53 : vector<1x8x8xf32> to vector<1x8x8xbf16>
    %55 = vector.extract_strided_slice %24 {offsets = [0, 0, 8], sizes = [1, 8, 8], strides = [1, 1, 1]} : vector<1x8x32xbf16> to vector<1x8x8xbf16>
    "tpu.trace_start"() <{level = 10 : i32, message = "bqk,bkd->bqd"}> : () -> ()
    %cst_21 = arith.constant dense<0.000000e+00> : vector<1x8x8xf32>
    %56 = tpu.matmul %54, %55, %cst_21 {dimension_numbers = #tpu.dot_dimension_numbers<[2], [1], [1], [2], [0, 0, 0, 1, 1, 2], [0], [0]>} : vector<1x8x8xbf16>, vector<1x8x8xbf16>, vector<1x8x8xf32> -> vector<1x8x8xf32>
    "tpu.trace_stop"() : () -> ()
    %57 = vector.extract_strided_slice %20 {offsets = [0, 0, 16], sizes = [1, 8, 8], strides = [1, 1, 1]} : vector<1x8x32xbf16> to vector<1x8x8xbf16>
    %58 = vector.extract_strided_slice %22 {offsets = [0, 0, 16], sizes = [1, 8, 8], strides = [1, 1, 1]} : vector<1x8x32xbf16> to vector<1x8x8xbf16>
    "tpu.trace_start"() <{level = 10 : i32, message = "bqd,bkd->bqk"}> : () -> ()
    %cst_22 = arith.constant dense<0.000000e+00> : vector<1x8x8xf32>
    %59 = tpu.matmul %57, %58, %cst_22 {dimension_numbers = #tpu.dot_dimension_numbers<[2], [2], [1], [1], [0, 0, 0, 1, 1, 1], [0], [0]>} : vector<1x8x8xbf16>, vector<1x8x8xbf16>, vector<1x8x8xf32> -> vector<1x8x8xf32>
    "tpu.trace_stop"() : () -> ()
    %cst_23 = arith.constant dense<0xFF800000> : vector<1x8xf32>
    %60 = vector.multi_reduction <maximumf>, %59, %cst_23 [2] : vector<1x8x8xf32> to vector<1x8xf32>
    %61 = vector.shape_cast %60 : vector<1x8xf32> to vector<1x8x1xf32>
    %62 = vector.broadcast %61 : vector<1x8x1xf32> to vector<1x8x8xf32>
    %63 = arith.subf %59, %62 : vector<1x8x8xf32>
    %64 = math.exp %63 : vector<1x8x8xf32>
    %cst_24 = arith.constant dense<0.000000e+00> : vector<1x8xf32>
    %65 = vector.multi_reduction <add>, %64, %cst_24 [2] : vector<1x8x8xf32> to vector<1x8xf32>
    %66 = vector.shape_cast %65 : vector<1x8xf32> to vector<1x8x1xf32>
    %67 = tpu.reciprocal %66 {approx = true} : vector<1x8x1xf32> -> vector<1x8x1xf32>
    %68 = vector.broadcast %67 : vector<1x8x1xf32> to vector<1x8x8xf32>
    %69 = arith.mulf %64, %68 : vector<1x8x8xf32>
    %70 = arith.truncf %69 : vector<1x8x8xf32> to vector<1x8x8xbf16>
    %71 = vector.extract_strided_slice %24 {offsets = [0, 0, 16], sizes = [1, 8, 8], strides = [1, 1, 1]} : vector<1x8x32xbf16> to vector<1x8x8xbf16>
    "tpu.trace_start"() <{level = 10 : i32, message = "bqk,bkd->bqd"}> : () -> ()
    %cst_25 = arith.constant dense<0.000000e+00> : vector<1x8x8xf32>
    %72 = tpu.matmul %70, %71, %cst_25 {dimension_numbers = #tpu.dot_dimension_numbers<[2], [1], [1], [2], [0, 0, 0, 1, 1, 2], [0], [0]>} : vector<1x8x8xbf16>, vector<1x8x8xbf16>, vector<1x8x8xf32> -> vector<1x8x8xf32>
    "tpu.trace_stop"() : () -> ()
    %73 = vector.extract_strided_slice %20 {offsets = [0, 0, 24], sizes = [1, 8, 8], strides = [1, 1, 1]} : vector<1x8x32xbf16> to vector<1x8x8xbf16>
    %74 = vector.extract_strided_slice %22 {offsets = [0, 0, 24], sizes = [1, 8, 8], strides = [1, 1, 1]} : vector<1x8x32xbf16> to vector<1x8x8xbf16>
    "tpu.trace_start"() <{level = 10 : i32, message = "bqd,bkd->bqk"}> : () -> ()
    %cst_26 = arith.constant dense<0.000000e+00> : vector<1x8x8xf32>
    %75 = tpu.matmul %73, %74, %cst_26 {dimension_numbers = #tpu.dot_dimension_numbers<[2], [2], [1], [1], [0, 0, 0, 1, 1, 1], [0], [0]>} : vector<1x8x8xbf16>, vector<1x8x8xbf16>, vector<1x8x8xf32> -> vector<1x8x8xf32>
    "tpu.trace_stop"() : () -> ()
    %cst_27 = arith.constant dense<0xFF800000> : vector<1x8xf32>
    %76 = vector.multi_reduction <maximumf>, %75, %cst_27 [2] : vector<1x8x8xf32> to vector<1x8xf32>
    %77 = vector.shape_cast %76 : vector<1x8xf32> to vector<1x8x1xf32>
    %78 = vector.broadcast %77 : vector<1x8x1xf32> to vector<1x8x8xf32>
    %79 = arith.subf %75, %78 : vector<1x8x8xf32>
    %80 = math.exp %79 : vector<1x8x8xf32>
    %cst_28 = arith.constant dense<0.000000e+00> : vector<1x8xf32>
    %81 = vector.multi_reduction <add>, %80, %cst_28 [2] : vector<1x8x8xf32> to vector<1x8xf32>
    %82 = vector.shape_cast %81 : vector<1x8xf32> to vector<1x8x1xf32>
    %83 = tpu.reciprocal %82 {approx = true} : vector<1x8x1xf32> -> vector<1x8x1xf32>
    %84 = vector.broadcast %83 : vector<1x8x1xf32> to vector<1x8x8xf32>
    %85 = arith.mulf %80, %84 : vector<1x8x8xf32>
    %86 = arith.truncf %85 : vector<1x8x8xf32> to vector<1x8x8xbf16>
    %87 = vector.extract_strided_slice %24 {offsets = [0, 0, 24], sizes = [1, 8, 8], strides = [1, 1, 1]} : vector<1x8x32xbf16> to vector<1x8x8xbf16>
    "tpu.trace_start"() <{level = 10 : i32, message = "bqk,bkd->bqd"}> : () -> ()
    %cst_29 = arith.constant dense<0.000000e+00> : vector<1x8x8xf32>
    %88 = tpu.matmul %86, %87, %cst_29 {dimension_numbers = #tpu.dot_dimension_numbers<[2], [1], [1], [2], [0, 0, 0, 1, 1, 2], [0], [0]>} : vector<1x8x8xbf16>, vector<1x8x8xbf16>, vector<1x8x8xf32> -> vector<1x8x8xf32>
    "tpu.trace_stop"() : () -> ()
    %89 = tpu.concatenate %40, %56, %72, %88 in 2 : vector<1x8x8xf32>, vector<1x8x8xf32>, vector<1x8x8xf32>, vector<1x8x8xf32> -> vector<1x8x32xf32>
    %90 = vector.shape_cast %89 : vector<1x8x32xf32> to vector<8x32xf32>
    %91 = arith.truncf %90 : vector<8x32xf32> to vector<8x32xbf16>
    %c0_30 = arith.constant 0 : index
    %c0_31 = arith.constant 0 : index
    %92 = vector.load %arg7[%c0_30, %c0_31] : memref<32x32xbf16, #tpu.memory_space<vmem>>, vector<32x32xbf16>
    %cst_32 = arith.constant dense<0.000000e+00> : vector<8x32xf32>
    %93 = tpu.matmul %91, %92, %cst_32 {dimension_numbers = #tpu.dot_dimension_numbers<[1], [0], [0], [1], [0, 0, 1, 1], [], []>} : vector<8x32xbf16>, vector<32x32xbf16>, vector<8x32xf32> -> vector<8x32xf32>
    %c0_33 = arith.constant 0 : index
    %c0_34 = arith.constant 0 : index
    %94 = vector.load %arg8[%c0_33, %c0_34] : memref<1x32xf32, #tpu.memory_space<vmem>>, vector<1x32xf32>
    %95 = vector.broadcast %94 : vector<1x32xf32> to vector<8x32xf32>
    %96 = arith.addf %93, %95 : vector<8x32xf32>
    %97 = arith.addf %2, %96 : vector<8x32xf32>
    %c0_35 = arith.constant 0 : index
    %c0_36 = arith.constant 0 : index
    %98 = vector.load %arg13[%c0_35, %c0_36] : memref<1x32xf32, #tpu.memory_space<vmem>>, vector<1x32xf32>
    %c0_37 = arith.constant 0 : index
    %c0_38 = arith.constant 0 : index
    %99 = vector.load %arg14[%c0_37, %c0_38] : memref<1x32xf32, #tpu.memory_space<vmem>>, vector<1x32xf32>
    %cst_39 = arith.constant dense<0.000000e+00> : vector<8xf32>
    %100 = vector.multi_reduction <add>, %97, %cst_39 [1] : vector<8x32xf32> to vector<8xf32>
    %101 = vector.shape_cast %100 : vector<8xf32> to vector<8x1xf32>
    %cst_40 = arith.constant 3.200000e+01 : f32
    %102 = vector.broadcast %cst_40 : f32 to vector<8x1xf32>
    %103 = arith.divf %101, %102 : vector<8x1xf32>
    %104 = vector.broadcast %103 : vector<8x1xf32> to vector<8x32xf32>
    %105 = arith.subf %97, %104 : vector<8x32xf32>
    %106 = arith.mulf %105, %105 : vector<8x32xf32>
    %cst_41 = arith.constant dense<0.000000e+00> : vector<8xf32>
    %107 = vector.multi_reduction <add>, %106, %cst_41 [1] : vector<8x32xf32> to vector<8xf32>
    %108 = vector.shape_cast %107 : vector<8xf32> to vector<8x1xf32>
    %cst_42 = arith.constant 3.200000e+01 : f32
    %109 = vector.broadcast %cst_42 : f32 to vector<8x1xf32>
    %110 = arith.divf %108, %109 : vector<8x1xf32>
    %111 = vector.broadcast %103 : vector<8x1xf32> to vector<8x32xf32>
    %112 = arith.subf %97, %111 : vector<8x32xf32>
    %cst_43 = arith.constant 9.99999974E-6 : f32
    %113 = vector.broadcast %cst_43 : f32 to vector<8x1xf32>
    %114 = arith.addf %110, %113 : vector<8x1xf32>
    %115 = math.rsqrt %114 : vector<8x1xf32>
    %116 = vector.broadcast %115 : vector<8x1xf32> to vector<8x32xf32>
    %117 = arith.mulf %112, %116 : vector<8x32xf32>
    %118 = vector.broadcast %98 : vector<1x32xf32> to vector<8x32xf32>
    %119 = arith.mulf %117, %118 : vector<8x32xf32>
    %120 = vector.broadcast %99 : vector<1x32xf32> to vector<8x32xf32>
    %121 = arith.addf %119, %120 : vector<8x32xf32>
    %122 = arith.truncf %121 : vector<8x32xf32> to vector<8x32xbf16>
    %c0_44 = arith.constant 0 : index
    %c0_45 = arith.constant 0 : index
    %123 = vector.load %arg9[%c0_44, %c0_45] : memref<32x64xbf16, #tpu.memory_space<vmem>>, vector<32x64xbf16>
    %cst_46 = arith.constant dense<0.000000e+00> : vector<8x64xf32>
    %124 = tpu.matmul %122, %123, %cst_46 {dimension_numbers = #tpu.dot_dimension_numbers<[1], [0], [0], [1], [0, 0, 1, 1], [], []>} : vector<8x32xbf16>, vector<32x64xbf16>, vector<8x64xf32> -> vector<8x64xf32>
    %c0_47 = arith.constant 0 : index
    %c0_48 = arith.constant 0 : index
    %125 = vector.load %arg10[%c0_47, %c0_48] : memref<1x64xf32, #tpu.memory_space<vmem>>, vector<1x64xf32>
    %126 = vector.broadcast %125 : vector<1x64xf32> to vector<8x64xf32>
    %127 = arith.addf %124, %126 : vector<8x64xf32>
    %cst_49 = arith.constant 0.000000e+00 : f32
    %128 = vector.broadcast %cst_49 : f32 to vector<8x64xf32>
    %129 = arith.maximumf %127, %128 : vector<8x64xf32>
    %130 = arith.truncf %129 : vector<8x64xf32> to vector<8x64xbf16>
    %c0_50 = arith.constant 0 : index
    %c0_51 = arith.constant 0 : index
    %131 = vector.load %arg11[%c0_50, %c0_51] : memref<64x32xbf16, #tpu.memory_space<vmem>>, vector<64x32xbf16>
    %cst_52 = arith.constant dense<0.000000e+00> : vector<8x32xf32>
    %132 = tpu.matmul %130, %131, %cst_52 {dimension_numbers = #tpu.dot_dimension_numbers<[1], [0], [0], [1], [0, 0, 1, 1], [], []>} : vector<8x64xbf16>, vector<64x32xbf16>, vector<8x32xf32> -> vector<8x32xf32>
    %c0_53 = arith.constant 0 : index
    %c0_54 = arith.constant 0 : index
    %133 = vector.load %arg12[%c0_53, %c0_54] : memref<1x32xf32, #tpu.memory_space<vmem>>, vector<1x32xf32>
    %134 = vector.broadcast %133 : vector<1x32xf32> to vector<8x32xf32>
    %135 = arith.addf %132, %134 : vector<8x32xf32>
    %136 = arith.addf %121, %135 : vector<8x32xf32>
    %c0_55 = arith.constant 0 : index
    %c0_56 = arith.constant 0 : index
    %137 = vector.load %arg15[%c0_55, %c0_56] : memref<1x32xf32, #tpu.memory_space<vmem>>, vector<1x32xf32>
    %c0_57 = arith.constant 0 : index
    %c0_58 = arith.constant 0 : index
    %138 = vector.load %arg16[%c0_57, %c0_58] : memref<1x32xf32, #tpu.memory_space<vmem>>, vector<1x32xf32>
    %cst_59 = arith.constant dense<0.000000e+00> : vector<8xf32>
    %139 = vector.multi_reduction <add>, %136, %cst_59 [1] : vector<8x32xf32> to vector<8xf32>
    %140 = vector.shape_cast %139 : vector<8xf32> to vector<8x1xf32>
    %cst_60 = arith.constant 3.200000e+01 : f32
    %141 = vector.broadcast %cst_60 : f32 to vector<8x1xf32>
    %142 = arith.divf %140, %141 : vector<8x1xf32>
    %143 = vector.broadcast %142 : vector<8x1xf32> to vector<8x32xf32>
    %144 = arith.subf %136, %143 : vector<8x32xf32>
    %145 = arith.mulf %144, %144 : vector<8x32xf32>
    %cst_61 = arith.constant dense<0.000000e+00> : vector<8xf32>
    %146 = vector.multi_reduction <add>, %145, %cst_61 [1] : vector<8x32xf32> to vector<8xf32>
    %147 = vector.shape_cast %146 : vector<8xf32> to vector<8x1xf32>
    %cst_62 = arith.constant 3.200000e+01 : f32
    %148 = vector.broadcast %cst_62 : f32 to vector<8x1xf32>
    %149 = arith.divf %147, %148 : vector<8x1xf32>
    %150 = vector.broadcast %142 : vector<8x1xf32> to vector<8x32xf32>
    %151 = arith.subf %136, %150 : vector<8x32xf32>
    %cst_63 = arith.constant 9.99999974E-6 : f32
    %152 = vector.broadcast %cst_63 : f32 to vector<8x1xf32>
    %153 = arith.addf %149, %152 : vector<8x1xf32>
    %154 = math.rsqrt %153 : vector<8x1xf32>
    %155 = vector.broadcast %154 : vector<8x1xf32> to vector<8x32xf32>
    %156 = arith.mulf %151, %155 : vector<8x32xf32>
    %157 = vector.broadcast %137 : vector<1x32xf32> to vector<8x32xf32>
    %158 = arith.mulf %156, %157 : vector<8x32xf32>
    %159 = vector.broadcast %138 : vector<1x32xf32> to vector<8x32xf32>
    %160 = arith.addf %158, %159 : vector<8x32xf32>
    %161 = vector.shape_cast %160 : vector<8x32xf32> to vector<1x8x32xf32>
    %c0_64 = arith.constant 0 : index
    %c0_65 = arith.constant 0 : index
    %c0_66 = arith.constant 0 : index
    %162 = vector.load %arg17[%c0_64, %c0_65, %c0_66] : memref<1x8x32xf32, #tpu.memory_space<vmem>>, vector<1x8x32xf32>
    tpu.vector_store %arg17[%c0_64, %c0_65, %c0_66], %161 {strides = array<i32>} : memref<1x8x32xf32, #tpu.memory_space<vmem>>, vector<1x8x32xf32>,
    return
  }
  func.func @transform_0(%arg0: i32) -> (i32, i32, i32) {
    %c0_i32 = arith.constant 0 : i32
    %c0_i32_0 = arith.constant 0 : i32
    %c0_i32_1 = arith.constant 0 : i32
    return %arg0, %c0_i32, %c0_i32_0 : i32, i32, i32
  }
  func.func @transform_1(%arg0: i32) -> (i32, i32, i32) {
    %c0_i32 = arith.constant 0 : i32
    %c0_i32_0 = arith.constant 0 : i32
    %c0_i32_1 = arith.constant 0 : i32
    return %arg0, %c0_i32, %c0_i32_0 : i32, i32, i32
  }
  func.func @transform_2(%arg0: i32) -> (i32, i32) {
    %c0_i32 = arith.constant 0 : i32
    %c0_i32_0 = arith.constant 0 : i32
    %c0_i32_1 = arith.constant 0 : i32
    return %c0_i32, %c0_i32_0 : i32, i32
  }
  func.func @transform_3(%arg0: i32) -> (i32, i32) {
    %c0_i32 = arith.constant 0 : i32
    %c0_i32_0 = arith.constant 0 : i32
    %c0_i32_1 = arith.constant 0 : i32
    return %c0_i32, %c0_i32_0 : i32, i32
  }
  func.func @transform_4(%arg0: i32) -> (i32, i32) {
    %c0_i32 = arith.constant 0 : i32
    %c0_i32_0 = arith.constant 0 : i32
    %c0_i32_1 = arith.constant 0 : i32
    return %c0_i32, %c0_i32_0 : i32, i32
  }
  func.func @transform_5(%arg0: i32) -> (i32, i32) {
    %c0_i32 = arith.constant 0 : i32
    %c0_i32_0 = arith.constant 0 : i32
    %c0_i32_1 = arith.constant 0 : i32
    return %c0_i32, %c0_i32_0 : i32, i32
  }
  func.func @transform_6(%arg0: i32) -> (i32, i32) {
    %c0_i32 = arith.constant 0 : i32
    %c0_i32_0 = arith.constant 0 : i32
    %c0_i32_1 = arith.constant 0 : i32
    return %c0_i32, %c0_i32_0 : i32, i32
  }
  func.func @transform_7(%arg0: i32) -> (i32, i32) {
    %c0_i32 = arith.constant 0 : i32
    %c0_i32_0 = arith.constant 0 : i32
    %c0_i32_1 = arith.constant 0 : i32
    return %c0_i32, %c0_i32_0 : i32, i32
  }
  func.func @transform_8(%arg0: i32) -> (i32, i32) {
    %c0_i32 = arith.constant 0 : i32
    %c0_i32_0 = arith.constant 0 : i32
    %c0_i32_1 = arith.constant 0 : i32
    return %c0_i32, %c0_i32_0 : i32, i32
  }
  func.func @transform_9(%arg0: i32) -> (i32, i32) {
    %c0_i32 = arith.constant 0 : i32
    %c0_i32_0 = arith.constant 0 : i32
    %c0_i32_1 = arith.constant 0 : i32
    return %c0_i32, %c0_i32_0 : i32, i32
  }
  func.func @transform_10(%arg0: i32) -> (i32, i32) {
    %c0_i32 = arith.constant 0 : i32
    %c0_i32_0 = arith.constant 0 : i32
    %c0_i32_1 = arith.constant 0 : i32
    return %c0_i32, %c0_i32_0 : i32, i32
  }
  func.func @transform_11(%arg0: i32) -> (i32, i32) {
    %c0_i32 = arith.constant 0 : i32
    %c0_i32_0 = arith.constant 0 : i32
    %c0_i32_1 = arith.constant 0 : i32
    return %c0_i32, %c0_i32_0 : i32, i32
  }
  func.func @transform_12(%arg0: i32) -> (i32, i32) {
    %c0_i32 = arith.constant 0 : i32
    %c0_i32_0 = arith.constant 0 : i32
    %c0_i32_1 = arith.constant 0 : i32
    return %c0_i32, %c0_i32_0 : i32, i32
  }
  func.func @transform_13(%arg0: i32) -> (i32, i32) {
    %c0_i32 = arith.constant 0 : i32
    %c0_i32_0 = arith.constant 0 : i32
    %c0_i32_1 = arith.constant 0 : i32
    return %c0_i32, %c0_i32_0 : i32, i32
  }
  func.func @transform_14(%arg0: i32) -> (i32, i32) {
    %c0_i32 = arith.constant 0 : i32
    %c0_i32_0 = arith.constant 0 : i32
    %c0_i32_1 = arith.constant 0 : i32
    return %c0_i32, %c0_i32_0 : i32, i32
  }
  func.func @transform_15(%arg0: i32) -> (i32, i32) {
    %c0_i32 = arith.constant 0 : i32
    %c0_i32_0 = arith.constant 0 : i32
    %c0_i32_1 = arith.constant 0 : i32
    return %c0_i32, %c0_i32_0 : i32, i32
  }
  func.func @transform_16(%arg0: i32) -> (i32, i32, i32) {
    %c0_i32 = arith.constant 0 : i32
    %c0_i32_0 = arith.constant 0 : i32
    %c0_i32_1 = arith.constant 0 : i32
    return %arg0, %c0_i32, %c0_i32_0 : i32, i32, i32
  }
}

</mosaic_0001>

<bundles_post_ra>
// kernel: tpu_custom_call.1
= control target key start
LH: loop header
LB: loop body
LE: loop exit
PB: predicated region body
PF: predicated region fallthrough
CT: control target
= control target key end

     0   :  { %s1918_s0 = inlined_call_operand.vmem [shape: f32[2,8,32], index: 0, kind: input, shape index: {}]   ;;  %s1919_s1 = inlined_call_operand.vmem [shape: f32[2,8,32], index: 1, kind: input, shape index: {}]   ;;  %s1920_s2 = inlined_call_operand.vmem [shape: bf16[32,64], index: 2, kind: input, shape index: {}]   ;;  %s1921_s3 = inlined_call_operand.vmem [shape: f32[1,64], index: 3, kind: input, shape index: {}]   ;;  %s1922_s4 = inlined_call_operand.hbm [shape: bf16[32,32], index: 4, kind: input, shape index: {}]   ;;  %s1923_s5 = inlined_call_operand.vmem [shape: f32[1,32], index: 5, kind: input, shape index: {}]   ;;  %s1924_s6 = inlined_call_operand.hbm [shape: bf16[32,32], index: 6, kind: input, shape index: {}]   ;;  %s1925_s7 = inlined_call_operand.vmem [shape: f32[1,32], index: 7, kind: input, shape index: {}]   ;;  %s1926_s8 = inlined_call_operand.hbm [shape: bf16[32,64], index: 8, kind: input, shape index: {}]   ;;  %s1927_s9 = inlined_call_operand.vmem [shape: f32[1,64], index: 9, kind: input, shape index: {}]   ;;  %s1928_s10 = inlined_call_operand.vmem [shape: bf16[64,32], index: 10, kind: input, shape index: {}]   ;;  %s1929_s11 = inlined_call_operand.vmem [shape: f32[1,32], index: 11, kind: input, shape index: {}]   ;;  %s1930_s12 = inlined_call_operand.vmem [shape: f32[1,32], index: 12, kind: input, shape index: {}]   ;;  %s1931_s13 = inlined_call_operand.vmem [shape: f32[1,32], index: 13, kind: input, shape index: {}]   ;;  %s1932_s14 = inlined_call_operand.vmem [shape: f32[1,32], index: 14, kind: input, shape index: {}]   ;;  %s1933_s15 = inlined_call_operand.vmem [shape: f32[1,32], index: 15, kind: input, shape index: {}]   ;;  %s1934_s16 = inlined_call_operand.hbm [shape: f32[2,8,32], index: 16, kind: output, shape index: {}]  }
   0x1   :  { %1941 = sst [smem:[#allocation18_spill]] %s1918_s0 }
   0x2   :  { %1942 = sst [smem:[#allocation19_spill]] %s1922_s4 }
   0x3   :  { %1943 = sst [smem:[#allocation20_spill]] %s1924_s6 }
   0x4   :  { %1944 = sst [smem:[#allocation21_spill]] %s1933_s15 }
   0x5   :  { %21 = vsyncpa [#allocation3], 0 }
   0x6   :  { %22 = vsyncpa [#allocation6], 0 }
   0x7   :  { %23 = vsyncpa [#allocation4], 0 }
   0x8   :  { %25 = vsyncpa [#allocation4 + $0x1], 0  ;;  %s1698_s21 = smov 0   ;;  %s1700_s22 = smov 0  }
   0x9   :  { %s1702_s23 = smov 0   ;;  %s1704_s24 = smov 0  }
   0xa LB: > { %1945 = sst [smem:[#allocation12_spill]] %s1583_s21  ;;  %s1719_s25 = sadd.s32 4294967295, %s1595_s24   ;;  %s1595_s24 = sphi %s1704_s24, %s1962_s24   ;;  %s1591_s23 = sphi %s1702_s23, %s1964_s23   ;;  %s1587_s22 = sphi %s1700_s22, %s1966_s22   ;;  %s1583_s21 = sphi %s1698_s21, %s1965_s21  }
   0xb   : > { %1946 = sst [smem:[#allocation13_spill]] %s1591_s23  ;;  %s1231_s26 = sadd.s32 4294967294, %s1595_s24  }
   0xc   : > { %1947 = sst [smem:[#allocation14_spill]] %s1595_s24  ;;  %s1723_s27 = sadd.s32 1, %s1595_s24  }
   0xd   : > { %1948 = sst [smem:[#allocation15_spill]] %s1723_s27  ;;  %s384_s28 = sadd.s32 1, %s1591_s23 }
   0xe   : > { %s381_s29 = ssub.s32 %s1595_s24, %s1723_s27  ;;  %p394_p0 = scmp.ne.s32.totalorder %s1591_s23, %s1587_s22 }
   0xf   : > { %p382_p1 = scmp.eq.s32.totalorder %s381_s29, 0  ;;  %p395_p2 = scmp.eq.s32.totalorder %s1719_s25, 1 }
  0x10   : > { %p400_p3 = scmp.ne.s32.totalorder %s1587_s22, %s1583_s21  ;;  %p401_p4 = scmp.eq.s32.totalorder %s1231_s26, 1 }
  0x11   : > { %s1734_s30 = scalar_select %p382_p1, %s1591_s23, %s384_s28  }
  0x12   : > { %p1736_p5 = por %p395_p2, %p394_p0  ;;  %p1740_p6 = por %p401_p4, %p400_p3 }
  0x13   : > { %1949 = sst [smem:[#allocation16_spill]] %s1734_s30  ;;  %p1232_p7 = scmp.ge.s32.totalorder %s1595_s24, 1 }
  0x14   : > { %s1951_s17 = scalar_select %p1740_p6, 1, 0 }
  0x15   : > { %p408_p8 = scmp.lt.s32.totalorder %s1595_s24, 3  ;;  %p1349_p9 = scmp.eq.s32.totalorder %s1719_s25, 0 }
  0x16   : > { %1952 = sst [smem:[#allocation17_spill]] %s1951_s17  ;;  %s1597_s27 = smov [#allocation5]  }
  0x17   : > { %p1747_p10 = pnand %p1232_p7, %p408_p8  ;;  %s1954_s6 = sld [smem:[#allocation20_spill]] }
  0x18   : > { %s1955_s4 = sld [smem:[#allocation19_spill]]  ;;  %s444_s17 = sshll.u32 %s1597_s27, 4  ;;  %s445_s17 = int_to_ptr.vmem [resolvable:$true] %s444_s17 }
  0x19   : > { %p1335_p11 = pneg %p1747_p10  ;;  %s1598_s19 = smov 64  }
  0x1a   : > { %s1599_s20 = smov 4   ;;  %s1601_s24 = smov [#allocation7]  }
  0x1b   : > { %p1761_p12 = pnand %p1349_p9, %p1335_p11  ;;  %s461_s15 = sshll.u32 %s1601_s24, 4  ;;  %s462_s15 = int_to_ptr.vmem [resolvable:$true] %s461_s15 }
  0x1d   : > { %s442_s26 = sshll.u32 %s1954_s6, 4  ;;  %s1600_s6 = smov [#allocation2]   ;;  %s443_s26 = int_to_ptr.hbm [resolvable:$true] %s442_s26 }
  0x1e   : > { %s425_s30 = sshll.u32 %s1955_s4, 4  ;;  %s427_s21 = sshll.u32 %s1600_s6, 4  ;;  %s426_s30 = int_to_ptr.hbm [resolvable:$true] %s425_s30  ;;  %s428_s21 = int_to_ptr.vmem [resolvable:$true] %s427_s21 }
  0x1f   : > { %1341 = dma.hbm_to_vmem [thread:$0]  (!%p1761_p12), %s443_s26, 256, %s445_s17, [#allocation6], %s1598_s19, %s1598_s19, %s1599_s20  }
  0x20   : > { %s459_s4 = sshll.u32 %s1926_s8, 4  ;;  %512 = sbr.rel (%p1747_p10) target bundleno = 2311 (0x907), region = 84  ;;  %s460_s4 = int_to_ptr.hbm [resolvable:$true] %s459_s4 }
  0x21   : > { %1338 = dma.hbm_to_vmem [thread:$0]  (!%p1761_p12), %s426_s30, 256, %s428_s21, [#allocation3], %s1598_s19, %s1598_s19, %s1599_s20  }
  0x22   : > { %1344 = dma.hbm_to_vmem [thread:$0]  (!%p1761_p12), %s460_s4, 256, %s462_s15, [#allocation6], %s1598_s19, %s1598_s19, %s1599_s20  }
  0x25   : > { %1570 = dma.done.wait (%p1349_p9), [#allocation3], 256  }
  0x26   : > { %1572 = vsyncadd (%p1349_p9), [#allocation3], 4294967040 }
  0x27   : > { %1574 = dma.done.wait (%p1349_p9), [#allocation6], 512  }
  0x28   : > { %1576 = vsyncadd (%p1349_p9), [#allocation6], 4294966784  ;;  %p576_p13 = scmp.lt.s32.totalorder %s1719_s25, 1  ;;  %s1957_s23 = sld [smem:[#allocation18_spill]]  ;;  %v1310_v0 = vld [vmem:[%s1920_s2 + $0x8] sm:$0xff]  ;;  %v1309_v2 = vld [vmem:[%s1920_s2] sm:$0xff] }
  0x29   : > { %619 = vmatpush.bf16.msra.mxu0 %v1310_v0  ;;  %vm609_vm0 = vcmask 261120   ;;  %v1404_v6 = vld [vmem:[%s1921_s3] ss:$0 sm:$0xff]  ;;  %s1604_s15 = smov 80   ;;  %s1605_s21 = smov 72   ;;  %v1312_v13 = vld [vmem:[#allocation2 + $0x8] sm:$0xff] }
  0x2a   : > { %s577_s6 = scalar_select %p576_p13, %s1719_s25, 1  ;;  %656 = vmatpush.bf16.msra.mxu1 %v1312_v13  ;;  %v1311_v14 = vld [vmem:[#allocation2] sm:$0xff]  ;;  %vm670_vm1 = vcmask 64512   ;;  %vm705_vm2 = vcmask 1043456   ;;  %vm906_vm3 = vcmask 130048   ;;  %vm908_vm4 = vcmask 195584  }
  0x2b   : > { %s1608_s27 = smov 88   ;;  %v1405_v36 = vld [vmem:[%s1923_s5] ss:$0 sm:$0xff]  ;;  %s1609_s18 = smov 16   ;;  %vm1062_vm9 = vcmask 523264  }
  0x2c   : > { %s1242_s4 = sshll.u32 %s577_s6, 3  ;;  %s1602_s6 = smov 120  }
  0x2d   : > { %s583_s17 = scalar_lea.vmem %s1919_s1, %s1242_s4  ;;  %620 = vmatpush.bf16.msra.mxu0 %v1309_v2  ;;  %s1610_s26 = smov 8  }
  0x2e   : > { %s579_s24 = scalar_lea.vmem %s1957_s23, %s1242_s4  ;;  %v586_v3 = vld [vmem:[%s583_s17] sm:$0xff]  ;;  %s1603_s4 = smov 96   ;;  %657 = vmatpush.bf16.msra.mxu1 %v1311_v14 }
  0x2f   : > { %v1795_v1 = vld [vmem:[%s579_s24] sm:$0xff]  ;;  %s1606_s23 = smov 112   ;;  %s1607_s24 = smov 104  }
  0x30   : > { %v587_v4 = vadd.f32 %v586_v3, %v1795_v1  ;;  %v626_v15 = vpack.c.bf16 %v1795_v1, %v1795_v1  ;;  %s1611_s19 = smov 24  }
  0x32   : > { %v588_v5 = vpack.c.bf16 %v587_v4, %v587_v4  ;;  %1261 = vmatmul.msk.bf16.vlgmr.msra.gmra.mxu1 %vm609_vm0, %v626_v15 }
  0x34   : > { %1252 = vmatmul.msk.bf16.vlgmr.msra.gmra.mxu0 %vm609_vm0, %v588_v5 }
  0xaf   : > { %v659_v23 = vpop.f32.mrf.mxu1 }
  0xb0   : > { %v660_v37 = vadd.f32 %v1405_v36, %v659_v23 }
  0xb1   : > { %v622_v7 = vpop.f32.mrf.mxu0 }
  0xb2   : > { %v623_v8 = vadd.f32 %v1404_v6, %v622_v7  ;;  %v664_v38 = vpack.c.bf16 %v660_v37, %v660_v37 }
  0xb4   : > { %v663_v9 = vpack.c.bf16 %v623_v8, %v623_v8  ;;  %v707_v39 = vsel %vm705_vm2, %v664_v38, 0  ;;  %v758_v61 = vunpack.c.l.b16 %v664_v38 }
  0xb5   : > { %716 = vmatpush.bf16.msra.mxu3 %v707_v39 }
  0xb6   : > { %v666_v10 = vunpack.c.l.b16 %v663_v9  ;;  %v759_v62 = vpack.c.b16 %v758_v61, %v758_v61  ;;  %v1315_v61 = vld [vmem:[#allocation7] sm:$0xff] }
  0xb7   : > { %v661_v24 = vpop.f32.mrf.mxu1 }
  0xb8   : > { %v667_v11 = vpack.c.b16 %v666_v10, %v666_v10 }
  0xb9   : > { %v624_v12 = vpop.f32.mrf.mxu0 }
  0xba   : > { %722 = vrot.lane.b32.xlu2 %v667_v11, %s1602_s6  ;;  %668 = vrot.lane.b32.xlu0 %v667_v11, %s1603_s4 }
  0xc2   : > { %783 = vrot.lane.b32.xlu2 %v667_v11, %s1604_s15  ;;  %s1306_s15 = sshll.u32 %s1719_s25, 3 }
  0xc3   : > { %s1124_s30 = scalar_lea.hbm %s1934_s16, %s1306_s15 }
  0xc4   : > { %s1128_s20 = sshll.u32 %s1124_s30, 4  ;;  %s1129_s20 = int_to_ptr.hbm [resolvable:$true] %s1128_s20 }
  0xc5   : > { %s1539_s29 = sshra.s32 %s1129_s20, 4  ;;  %s1540_s29 = int_to_ptr.hbm [resolvable:$true] %s1539_s29 }
  0xc6   : > { %s1541_s15 = scalar_lea.hbm %s1540_s29, 8  ;;  %p1546_p3 = scmp.lt.s32.totalorder %s1540_s29, %s1934_s16 }
  0xc7   : > { %p1542_p0 = scmp.ne.s32.totalorder %s1540_s29, %s1541_s15 }
  0xc9   : > { %p1543_p1 = pnand %p1542_p0, %p1736_p5 }
  0xca   : > { %839 = vrot.lane.b32.xlu2 %v667_v11, %s1605_s21 }
  0xcb   : > { %p1544_p2 = pneg %p1543_p1 }
  0xd2   : > { %781 = vrot.lane.b32.xlu2 %v667_v11, %s1606_s23 }
  0xda   : > { %837 = vrot.lane.b32.xlu2 %v667_v11, %s1607_s24 }
 0x114   : > { %v723_v16 = vpop.permute.xlu2 %722 }
 0x11c   : > { %v784_v17 = vpop.permute.xlu2 %783 }
 0x11d   : > { %v789_v18 = vsel %vm670_vm1, %v784_v17, 0 }
 0x11e   : > { %798 = vmatpush.bf16.xpose.msrb.mxu1 %v789_v18 }
 0x124   : > { %v840_v19 = vpop.permute.xlu2 %839 }
 0x125   : > { %v845_v46 = vsel %vm670_vm1, %v840_v19, 0 }
 0x12c   : > { %v782_v20 = vpop.permute.xlu2 %781  ;;  %v669_v21 = vpop.permute.xlu0 %668 }
 0x12d   : > { %1266 = vmatmul.msk.bf16.vlgmr.msrb.gmra.mxu1 %vm670_vm1, %v782_v20  ;;  %v675_v22 = vsel %vm670_vm1, %v669_v21, 0 }
 0x12e   : > { %684 = vmatpush.bf16.xpose.msra.mxu2 %v675_v22 }
 0x134   : > { %v838_v47 = vpop.permute.xlu2 %837 }
 0x135   : > { %1262 = vmatmul.msk.bf16.vlgmr.msra.gmra.mxu2 %vm670_vm1, %v663_v9 }
 0x1aa   : > { %v800_v25 = vpop.f32.mrf.mxu1 }
 0x1ab   : > { %v804_v26 = vsel %vm670_vm1, %v800_v25, -inf }
 0x1ac   : > { %805 = vmax.xlane.f32.xlu2 %v804_v26 }
 0x1b2   : > { %v802_v27 = vpop.f32.mrf.mxu1 }
 0x1b8   : > { %v686_v28 = vpop.f32.mrf.mxu2 }
 0x1b9   : > { %v690_v29 = vsel %vm670_vm1, %v686_v28, -inf }
 0x1ba   : > { %691 = vmax.xlane.f32.xlu0 %v690_v29 }
 0x1c0   : > { %v688_v30 = vpop.f32.mrf.mxu2 }
 0x21f   : > { %v806_v50 = vpop.xlane.xlu2 %805 }
 0x220   : > { %v807_v51 = vsub.f32 %v800_v25, %v806_v50 }
 0x222   : > { %v808_v52 = vmul.f32 1.442695, %v807_v51 }
 0x22d   : > { %v692_v31 = vpop.xlane.xlu0 %691 }
 0x22e   : > { %v693_v32 = vsub.f32 %v686_v28, %v692_v31 }
 0x230   : > { %v694_v33 = vmul.f32 1.442695, %v693_v32 }
 0x232   : > { %1413 = vpow2.f32 %v694_v33 }
 0x238   : > { %v1414_v34 = vpop.eup %1413 }
 0x239   : > { %v696_v35 = vsel %vm670_vm1, %v1414_v34, 0.0 }
 0x23a   : > { %697 = vadd.xlane.f32.xlu1 %v696_v35  ;;  %v1313_v35 = vld [vmem:[#allocation5] sm:$0xff] }
 0x253   : > { %724 = vrot.lane.b32.xlu1 %v667_v11, %s1608_s27 }
 0x2ad   : > { %v698_v40 = vpop.xlane.xlu1 %697 }
 0x2ae   : > { %1415 = vrcp.f32 %v698_v40 }
 0x2af   : > { %1417 = vpow2.f32 %v808_v52 }
 0x2b4   : > { %v1416_v41 = vpop.eup %1415 }
 0x2b5   : > { %v700_v42 = vmul.f32 %v1416_v41, %v1414_v34  ;;  %v1418_v55 = vpop.eup %1417  ;;  %v1314_v34 = vld [vmem:[#allocation5 + $0x8] sm:$0xff] }
 0x2b6   : > { %v810_v57 = vsel %vm670_vm1, %v1418_v55, 0.0  ;;  %940 = vmatpush.bf16.msra.mxu1 %v1314_v34 }
 0x2b7   : > { %v701_v43 = vpack.c.bf16 %v700_v42, %v700_v42 }
 0x2b9   : > { %1263 = vmatmul.msk.bf16.vlgmr.msra.gmra.mxu3 %vm670_vm1, %v701_v43  ;;  %v1406_v43 = vld [vmem:[%s1925_s7] ss:$0 sm:$0xff] }
 0x2ba   : > { %941 = vmatpush.bf16.msra.mxu1 %v1313_v35 }
 0x2c5   : > { %v725_v44 = vpop.permute.xlu1 %724 }
 0x2c6   : > { %v730_v45 = vsel %vm670_vm1, %v725_v44, 0 }
 0x2c7   : > { %739 = vmatpush.bf16.xpose.msrb.mxu3 %v730_v45 }
 0x2ce   : > { %1264 = vmatmul.msk.bf16.vlgmr.msrb.gmra.mxu3 %vm670_vm1, %v723_v16 }
 0x2cf   : > { %854 = vmatpush.bf16.xpose.msra.mxu3 %v845_v46 }
 0x2de   : > { %1268 = vmatmul.msk.bf16.vlgmr.msra.gmra.mxu3 %vm670_vm1, %v838_v47 }
 0x33c   : > { %v1827_v48 = vpop.f32.mrf.mxu3 }
 0x344   : > { %v720_v49 = vpop.f32.mrf.mxu3 }
 0x345   : > { %v1612_v49 = vmov 32.0  }
 0x351   : > { %v741_v53 = vpop.f32.mrf.mxu3 }
 0x352   : > { %v745_v54 = vsel %vm670_vm1, %v741_v53, -inf }
 0x353   : > { %746 = vmax.xlane.f32.xlu1 %v745_v54 }
 0x359   : > { %v743_v56 = vpop.f32.mrf.mxu3 }
 0x35b   : > { %811 = vadd.xlane.f32.xlu1 %v810_v57 }
 0x361   : > { %v856_v58 = vpop.f32.mrf.mxu3 }
 0x362   : > { %v860_v59 = vsel %vm670_vm1, %v856_v58, -inf }
 0x363   : > { %861 = vmax.xlane.f32.xlu0 %v860_v59 }
 0x369   : > { %v858_v60 = vpop.f32.mrf.mxu3 }
 0x374   : > { %816 = vrot.lane.b32.xlu1 %v759_v62, %s1606_s23 }
 0x377   : > { %760 = vrot.lane.b32.xlu0 %v759_v62, %s1602_s6  ;;  %s573_s6 = sand.u32 1, %s1587_s22  }
 0x378   : > { %s1241_s4 = sshll.u32 %s573_s6, 3  ;;  %s1114_s28 = scalar_lea.sflag [#allocation4], %s573_s6 }
 0x3c6   : > { %v747_v63 = vpop.xlane.xlu1 %746 }
 0x3c7   : > { %v748_v0 = vsub.f32 %v741_v53, %v747_v63 }
 0x3c9   : > { %v749_v2 = vmul.f32 1.442695, %v748_v0 }
 0x3cb   : > { %1419 = vpow2.f32 %v749_v2  ;;  %v1319_v2 = vld [vmem:[%s1928_s10 + $0x10] sm:$0xff] }
 0x3ce   : > { %v812_v7 = vpop.xlane.xlu1 %811 }
 0x3d1   : > { %v1420_v3 = vpop.eup %1419 }
 0x3d2   : > { %v751_v4 = vsel %vm670_vm1, %v1420_v3, 0.0 }
 0x3d3   : > { %752 = vadd.xlane.f32.xlu0 %v751_v4 }
 0x3d6   : > { %v862_v5 = vpop.xlane.xlu0 %861 }
 0x3d7   : > { %v863_v6 = vsub.f32 %v856_v58, %v862_v5 }
 0x3d9   : > { %v864_v8 = vmul.f32 1.442695, %v863_v6 }
 0x3db   : > { %1421 = vpow2.f32 %v864_v8 }
 0x3dc   : > { %1423 = vrcp.f32 %v812_v7 }
 0x3e1   : > { %v1422_v9 = vpop.eup %1421 }
 0x3e2   : > { %v1424_v10 = vpop.eup %1423  ;;  %v866_v11 = vsel %vm670_vm1, %v1422_v9, 0.0 }
 0x3e3   : > { %867 = vadd.xlane.f32.xlu2 %v866_v11  ;;  %v814_v12 = vmul.f32 %v1424_v10, %v1418_v55  ;;  %v1407_v10 = vld [vmem:[%s1930_s12] ss:$0 sm:$0xff] }
 0x3e5   : > { %v815_v16 = vpack.c.bf16 %v814_v12, %v814_v12  ;;  %v1408_v12 = vld [vmem:[%s1931_s13] ss:$0 sm:$0xff] }
 0x3e6   : > { %v817_v13 = vpop.permute.xlu1 %816 }
 0x3e7   : > { %872 = vrot.lane.b32.xlu0 %v759_v62, %s1607_s24  ;;  %v822_v14 = vsel %vm705_vm2, %v817_v13, 0  ;;  %v1320_v62 = vld [vmem:[%s1928_s10 + $0x18] sm:$0xff] }
 0x3e8   : > { %831 = vmatpush.bf16.msrb.mxu2 %v822_v14  ;;  %1070 = vmatpush.bf16.msrb.mxu3 %v1320_v62 }
 0x3e9   : > { %v761_v15 = vpop.permute.xlu0 %760 }
 0x3ea   : > { %v766_v17 = vsel %vm705_vm2, %v761_v15, 0 }
 0x3eb   : > { %775 = vmatpush.bf16.msrb.mxu0 %v766_v17  ;;  %1267 = vmatmul.msk.bf16.vlgmr.msrb.gmra.mxu2 %vm670_vm1, %v815_v16  ;;  %v1318_v17 = vld [vmem:[%s1928_s10 + $0x8] sm:$0xff] }
 0x3ec   : > { %1071 = vmatpush.bf16.msrb.mxu3 %v1319_v2 }
 0x3f0   : > { %1072 = vmatpush.bf16.msrb.mxu3 %v1318_v17 }
 0x446   : > { %v753_v18 = vpop.xlane.xlu0 %752 }
 0x447   : > { %1425 = vrcp.f32 %v753_v18  ;;  %v1317_v18 = vld [vmem:[%s1928_s10] sm:$0xff] }
 0x448   : > { %1073 = vmatpush.bf16.msrb.mxu3 %v1317_v18 }
 0x44d   : > { %v1426_v19 = vpop.eup %1425 }
 0x44e   : > { %v755_v20 = vmul.f32 %v1426_v19, %v1420_v3  ;;  %v1409_v19 = vld [vmem:[%s1927_s9] ss:$0 sm:$0xff] }
 0x450   : > { %v756_v21 = vpack.c.bf16 %v755_v20, %v755_v20 }
 0x452   : > { %1265 = vmatmul.msk.bf16.vlgmr.msrb.gmra.mxu0 %vm670_vm1, %v756_v21 }
 0x456   : > { %v868_v22 = vpop.xlane.xlu2 %867 }
 0x457   : > { %1427 = vrcp.f32 %v868_v22 }
 0x458   : > { %1429 = vrcp.f32 %v1612_v49 }
 0x459   : > { %v873_v23 = vpop.permute.xlu0 %872 }
 0x45a   : > { %v878_v24 = vsel %vm705_vm2, %v873_v23, 0 }
 0x45b   : > { %887 = vmatpush.bf16.msra.mxu0 %v878_v24 }
 0x45d   : > { %v1428_v25 = vpop.eup %1427 }
 0x45e   : > { %v870_v26 = vmul.f32 %v1428_v25, %v1422_v9  ;;  %v1430_v50 = vpop.eup %1429  ;;  %v1410_v25 = vld [vmem:[%s1929_s11] ss:$0 sm:$0xff] }
 0x45f   : > { %v954_v51 = vmul.f32 32.0, %v1430_v50  ;;  %vm958_vm5 = vweird.f32 %v1430_v50 }
 0x460   : > { %v871_v27 = vpack.c.bf16 %v870_v26, %v870_v26 }
 0x461   : > { %v955_v52 = vsub.f32 1.0, %v954_v51 }
 0x462   : > { %1269 = vmatmul.msk.bf16.vlgmr.msra.gmra.mxu0 %vm670_vm1, %v871_v27 }
 0x463   : > { %v956_v53 = vmul.f32 %v1430_v50, %v955_v52 }
 0x465   : > { %v957_v54 = vadd.f32 %v1430_v50, %v956_v53 }
 0x467   : > { %v959_v55 = vsel %vm958_vm5, %v1430_v50, %v957_v54 }
 0x46e   : > { %v833_v28 = vpop.f32.mrf.mxu2 }
 0x46f   : > { %898 = vrot.lane.b32.xlu0 %v833_v28, %s1609_s18 }
 0x476   : > { %v835_v29 = vpop.f32.mrf.mxu2 }
 0x4cf   : > { %v777_v30 = vpop.f32.mrf.mxu0 }
 0x4d0   : > { %894 = vrot.lane.b32.xlu2 %v777_v30, %s1610_s26  ;;  %s1958_s26 = sld [smem:[#allocation21_spill]] }
 0x4d7   : > { %v779_v31 = vpop.f32.mrf.mxu0 }
 0x4df   : > { %v889_v32 = vpop.f32.mrf.mxu0 }
 0x4e0   : > { %902 = vrot.lane.b32.xlu0 %v889_v32, %s1611_s19  ;;  %s575_s19 = scalar_lea.vmem [#allocation8], %s1241_s4  ;;  %s1545_s4 = scalar_lea.hbm %s1934_s16, 16 }
 0x4e1   : > { %v899_v36 = vpop.permute.xlu0 %898  ;;  %s1126_s25 = sshll.u32 %s575_s19, 4  ;;  %p1547_p4 = scmp.lt.s32.totalorder %s1545_s4, %s1541_s15  ;;  %s1127_s25 = int_to_ptr.vmem [resolvable:$true] %s1126_s25 }
 0x4e3   : > { %p1548_p7 = por %p1547_p4, %p1546_p3 }
 0x4e5   : > { %p1549_p8 = pnand %p1548_p7, %p1544_p2 }
 0x4e7   : > { %v891_v33 = vpop.f32.mrf.mxu0 }
 0x52a   : > { %v895_v37 = vpop.permute.xlu2 %894 }
 0x52b   : > { %v905_v38 = vsel %vm670_vm1, %v1827_v48, %v895_v37 }
 0x52c   : > { %v907_v39 = vsel %vm906_vm3, %v905_v38, %v899_v36 }
 0x552   : > { %v903_v40 = vpop.permute.xlu0 %902 }
 0x553   : > { %v909_v41 = vsel %vm908_vm4, %v907_v39, %v903_v40 }
 0x554   : > { %v910_v42 = vpack.c.bf16 %v909_v41, %v909_v41 }
 0x556   : > { %1278 = vmatmul.msk.bf16.vlgmr.msra.gmra.mxu1 %vm609_vm0, %v910_v42 }
 0x5d3   : > { %v943_v44 = vpop.f32.mrf.mxu1 }
 0x5d4   : > { %v944_v45 = vadd.f32 %v1406_v43, %v943_v44 }
 0x5d6   : > { %v947_v46 = vadd.f32 %v944_v45, %v1795_v1  ;;  %v1316_v1 = vld [vmem:[#allocation7 + $0x8] sm:$0xff]  ;;  %v1411_v45 = vld [vmem:[%s1932_s14] ss:$0 sm:$0xff] }
 0x5d7   : > { %1017 = vmatpush.bf16.msra.mxu2 %v1316_v1 }
 0x5d8   : > { %v950_v47 = vsel %vm609_vm0, %v947_v46, 0.0 }
 0x5d9   : > { %951 = vadd.xlane.f32.xlu1 %v950_v47 }
 0x5db   : > { %v945_v48 = vpop.f32.mrf.mxu1  ;;  %1018 = vmatpush.bf16.msra.mxu2 %v1315_v61 }
 0x5dc   : > { %v1412_v48 = vld [vmem:[%s1958_s26] ss:$0 sm:$0xff] }
 0x64c   : > { %v952_v56 = vpop.xlane.xlu1 %951 }
 0x64d   : > { %v960_v57 = vmul.f32 %v959_v55, %v952_v56 }
 0x64f   : > { %v961_v58 = vsub.f32 %v947_v46, %v960_v57 }
 0x651   : > { %v962_v59 = vmul.f32 %v961_v58, %v961_v58 }
 0x653   : > { %v963_v60 = vsel %vm609_vm0, %v962_v59, 0.0 }
 0x654   : > { %964 = vadd.xlane.f32.xlu0 %v963_v60 }
 0x6c7   : > { %v965_v63 = vpop.xlane.xlu0 %964 }
 0x6c8   : > { %v966_v0 = vmul.f32 %v965_v63, %v959_v55 }
 0x6ca   : > { %v967_v3 = vadd.f32 1e-05, %v966_v0 }
 0x6cc   : > { %1431 = vrsqrt.f32 %v967_v3  ;;  %vm974_vm7 = vweird.f32 %v967_v3 }
 0x6d2   : > { %v1432_v4 = vpop.eup %1431 }
 0x6d3   : > { %v969_v5 = vmul.f32 %v1432_v4, %v967_v3  ;;  %vm975_vm6 = vweird.f32 %v1432_v4 }
 0x6d4   : > { %vm976_vm8 = vmor %vm974_vm7, %vm975_vm6 }
 0x6d5   : > { %v970_v6 = vmul.f32 %v1432_v4, %v969_v5 }
 0x6d7   : > { %v971_v7 = vmul.f32 0.5, %v970_v6 }
 0x6d9   : > { %v972_v8 = vsub.f32 1.5, %v971_v7 }
 0x6db   : > { %v973_v9 = vmul.f32 %v1432_v4, %v972_v8 }
 0x6dd   : > { %v977_v11 = vsel %vm976_vm8, %v1432_v4, %v973_v9 }
 0x6de   : > { %v978_v13 = vmul.f32 %v977_v11, %v961_v58 }
 0x6e0   : > { %v982_v14 = vmul.f32 %v1407_v10, %v978_v13 }
 0x6e2   : > { %v986_v15 = vadd.f32 %v1408_v12, %v982_v14 }
 0x6e4   : > { %v987_v16 = vpack.c.bf16 %v986_v15, %v986_v15 }
 0x6e6   : > { %1287 = vmatmul.msk.bf16.vlgmr.msra.gmra.mxu2 %vm609_vm0, %v987_v16 }
 0x769   : > { %v1020_v20 = vpop.f32.mrf.mxu2 }
 0x76a   : > { %v1021_v21 = vadd.f32 %v1409_v19, %v1020_v20 }
 0x76c   : > { %v1024_v22 = vmax.f32 %v1021_v21, 0.0 }
 0x76e   : > { %v1025_v23 = vpack.c.bf16 %v1024_v22, %v1024_v22 }
 0x770   : > { %1304 = vmatmul.msk.bf16.vlgmr.msrb.gmra.mxu3 %vm1062_vm9, %v1025_v23 }
 0x771   : > { %v1022_v24 = vpop.f32.mrf.mxu2 }
 0x7f3   : > { %v1075_v26 = vpop.f32.mrf.mxu3 }
 0x7f4   : > { %v1076_v27 = vadd.f32 %v1410_v25, %v1075_v26 }
 0x7f6   : > { %v1079_v28 = vadd.f32 %v1076_v27, %v986_v15 }
 0x7f8   : > { %v1082_v29 = vsel %vm609_vm0, %v1079_v28, 0.0 }
 0x7f9   : > { %1083 = vadd.xlane.f32.xlu2 %v1082_v29 }
 0x7fb   : > { %v1077_v30 = vpop.f32.mrf.mxu3 }
 0x86c   : > { %v1084_v31 = vpop.xlane.xlu2 %1083 }
 0x86d   : > { %v1085_v32 = vmul.f32 %v1084_v31, %v959_v55 }
 0x86f   : > { %v1086_v33 = vsub.f32 %v1079_v28, %v1085_v32 }
 0x871   : > { %v1087_v34 = vmul.f32 %v1086_v33, %v1086_v33 }
 0x873   : > { %v1088_v35 = vsel %vm609_vm0, %v1087_v34, 0.0 }
 0x874   : > { %1089 = vadd.xlane.f32.xlu1 %v1088_v35 }
 0x8e7   : > { %v1090_v36 = vpop.xlane.xlu1 %1089 }
 0x8e8   : > { %v1091_v37 = vmul.f32 %v1090_v36, %v959_v55 }
 0x8ea   : > { %v1092_v38 = vadd.f32 1e-05, %v1091_v37 }
 0x8ec   : > { %1433 = vrsqrt.f32 %v1092_v38  ;;  %vm1099_vm11 = vweird.f32 %v1092_v38 }
 0x8f2   : > { %v1434_v39 = vpop.eup %1433 }
 0x8f3   : > { %v1094_v40 = vmul.f32 %v1434_v39, %v1092_v38  ;;  %vm1100_vm10 = vweird.f32 %v1434_v39 }
 0x8f4   : > { %vm1101_vm12 = vmor %vm1099_vm11, %vm1100_vm10 }
 0x8f5   : > { %v1095_v41 = vmul.f32 %v1434_v39, %v1094_v40 }
 0x8f7   : > { %v1096_v42 = vmul.f32 0.5, %v1095_v41 }
 0x8f9   : > { %v1097_v43 = vsub.f32 1.5, %v1096_v42 }
 0x8fb   : > { %v1098_v44 = vmul.f32 %v1434_v39, %v1097_v43 }
 0x8fd   : > { %v1102_v46 = vsel %vm1101_vm12, %v1434_v39, %v1098_v44 }
 0x8fe   : > { %v1103_v47 = vmul.f32 %v1102_v46, %v1086_v33 }
 0x900   : > { %v1107_v49 = vmul.f32 %v1411_v45, %v1103_v47 }
 0x902   : > { %v1111_v50 = vadd.f32 %v1412_v48, %v1107_v49 }
 0x904   : > { %1112 = vst.msk [vmem:[%s575_s19] sm:$0xff] %vm609_vm0, %v1111_v50 }
 0x905   : > { %1552 = shalt.err (!%p1549_p8)
}
 0x906   : > { %1333 = dma.vmem_to_hbm [thread:$0]  (%p1736_p5), %s1127_s25, 128, %s1129_s20, %s1114_s28  }
 0x907 PF: > { %s1959_s6 = sld [smem:[#allocation14_spill]] }
 0x908   : > { %s1960_s30 = sld [smem:[#allocation12_spill]] }
 0x90d   : > { %p1355_p9 = scmp.ge.s32.totalorder %s1959_s6, 2 }
 0x90e   : > { %s1140_s18 = sand.u32 1, %s1960_s30  }
 0x90f   : > { %p1346_p10 = pnand %p1355_p9, %p1740_p6  ;;  %s1141_s26 = scalar_lea.sflag [#allocation4], %s1140_s18 }
 0x911   : > { %p1347_p11 = pneg %p1346_p10 }
 0x913   : > { %1578 = dma.done.wait (%p1347_p11), %s1141_s26, 128  }
 0x914   : > { %1580 = vsyncadd (%p1347_p11), %s1141_s26, 4294967168  ;;  %s1962_s24 = sld [smem:[#allocation15_spill]]  ;;  %s1965_s21 = smov %s1587_s22 }
 0x915   : > { %s1963_s19 = sld [smem:[#allocation13_spill]] }
 0x916   : > { %s1964_s23 = sld [smem:[#allocation16_spill]] }
 0x91a   : > { %p28_p12 = scmp.ge.s32.totalorder %s1962_s24, 4  }
 0x91b   : > { %s1966_s22 = smov %s1963_s19 }
 0x91c   :  { %30 = sbr.rel (!%p28_p12) target bundleno = 10 (0xa), region = 135 }
 0x921   :  { %1147 = vsyncpa [#allocation3], 1 }
 0x922   :  { %1149 = vsyncpa [#allocation3 + $0x1], 1 }
 0x923   :  { %1150 = vsyncpa [#allocation6], 1 }
 0x924   :  { %1151 = vsyncpa [#allocation4], 1 }
 0x925   :  { %1153 = vsyncpa [#allocation4 + $0x1], 1 }

// kernel: tpu_custom_call.1
= control target key start
LH: loop header
LB: loop body
LE: loop exit
PB: predicated region body
PF: predicated region fallthrough
CT: control target
= control target key end

     0   :  { %s1918_s0 = inlined_call_operand.vmem [shape: f32[2,8,32], index: 0, kind: input, shape index: {}]   ;;  %s1919_s1 = inlined_call_operand.vmem [shape: f32[2,8,32], index: 1, kind: input, shape index: {}]   ;;  %s1920_s2 = inlined_call_operand.vmem [shape: bf16[32,64], index: 2, kind: input, shape index: {}]   ;;  %s1921_s3 = inlined_call_operand.vmem [shape: f32[1,64], index: 3, kind: input, shape index: {}]   ;;  %s1922_s4 = inlined_call_operand.hbm [shape: bf16[32,32], index: 4, kind: input, shape index: {}]   ;;  %s1923_s5 = inlined_call_operand.vmem [shape: f32[1,32], index: 5, kind: input, shape index: {}]   ;;  %s1924_s6 = inlined_call_operand.hbm [shape: bf16[32,32], index: 6, kind: input, shape index: {}]   ;;  %s1925_s7 = inlined_call_operand.vmem [shape: f32[1,32], index: 7, kind: input, shape index: {}]   ;;  %s1926_s8 = inlined_call_operand.hbm [shape: bf16[32,64], index: 8, kind: input, shape index: {}]   ;;  %s1927_s9 = inlined_call_operand.vmem [shape: f32[1,64], index: 9, kind: input, shape index: {}]   ;;  %s1928_s10 = inlined_call_operand.vmem [shape: bf16[64,32], index: 10, kind: input, shape index: {}]   ;;  %s1929_s11 = inlined_call_operand.vmem [shape: f32[1,32], index: 11, kind: input, shape index: {}]   ;;  %s1930_s12 = inlined_call_operand.vmem [shape: f32[1,32], index: 12, kind: input, shape index: {}]   ;;  %s1931_s13 = inlined_call_operand.vmem [shape: f32[1,32], index: 13, kind: input, shape index: {}]   ;;  %s1932_s14 = inlined_call_operand.vmem [shape: f32[1,32], index: 14, kind: input, shape index: {}]   ;;  %s1933_s15 = inlined_call_operand.vmem [shape: f32[1,32], index: 15, kind: input, shape index: {}]   ;;  %s1934_s16 = inlined_call_operand.hbm [shape: f32[2,8,32], index: 16, kind: output, shape index: {}]  }
   0x1   :  { %1941 = sst [smem:[#allocation18_spill]] %s1918_s0 }
   0x2   :  { %1942 = sst [smem:[#allocation19_spill]] %s1922_s4 }
   0x3   :  { %1943 = sst [smem:[#allocation20_spill]] %s1924_s6 }
   0x4   :  { %1944 = sst [smem:[#allocation21_spill]] %s1933_s15 }
   0x5   :  { %21 = vsyncpa [#allocation3], 0 }
   0x6   :  { %22 = vsyncpa [#allocation6], 0 }
   0x7   :  { %23 = vsyncpa [#allocation4], 0 }
   0x8   :  { %25 = vsyncpa [#allocation4 + $0x1], 0  ;;  %s1698_s21 = smov 0   ;;  %s1700_s22 = smov 0  }
   0x9   :  { %s1702_s23 = smov 0   ;;  %s1704_s24 = smov 0  }
   0xa LB: > { %1945 = sst [smem:[#allocation12_spill]] %s1583_s21  ;;  %s1719_s25 = sadd.s32 4294967295, %s1595_s24   ;;  %s1595_s24 = sphi %s1704_s24, %s1962_s24   ;;  %s1591_s23 = sphi %s1702_s23, %s1964_s23   ;;  %s1587_s22 = sphi %s1700_s22, %s1966_s22   ;;  %s1583_s21 = sphi %s1698_s21, %s1965_s21  }
   0xb   : > { %1946 = sst [smem:[#allocation13_spill]] %s1591_s23  ;;  %s1231_s26 = sadd.s32 4294967294, %s1595_s24  }
   0xc   : > { %1947 = sst [smem:[#allocation14_spill]] %s1595_s24  ;;  %s1723_s27 = sadd.s32 1, %s1595_s24  }
   0xd   : > { %1948 = sst [smem:[#allocation15_spill]] %s1723_s27  ;;  %s384_s28 = sadd.s32 1, %s1591_s23 }
   0xe   : > { %s381_s29 = ssub.s32 %s1595_s24, %s1723_s27  ;;  %p394_p0 = scmp.ne.s32.totalorder %s1591_s23, %s1587_s22 }
   0xf   : > { %p382_p1 = scmp.eq.s32.totalorder %s381_s29, 0  ;;  %p395_p2 = scmp.eq.s32.totalorder %s1719_s25, 1 }
  0x10   : > { %p400_p3 = scmp.ne.s32.totalorder %s1587_s22, %s1583_s21  ;;  %p401_p4 = scmp.eq.s32.totalorder %s1231_s26, 1 }
  0x11   : > { %s1734_s30 = scalar_select %p382_p1, %s1591_s23, %s384_s28  }
  0x12   : > { %p1736_p5 = por %p395_p2, %p394_p0  ;;  %p1740_p6 = por %p401_p4, %p400_p3 }
  0x13   : > { %1949 = sst [smem:[#allocation16_spill]] %s1734_s30  ;;  %p1232_p7 = scmp.ge.s32.totalorder %s1595_s24, 1 }
  0x14   : > { %s1951_s17 = scalar_select %p1740_p6, 1, 0 }
  0x15   : > { %p408_p8 = scmp.lt.s32.totalorder %s1595_s24, 3  ;;  %p1349_p9 = scmp.eq.s32.totalorder %s1719_s25, 0 }
  0x16   : > { %1952 = sst [smem:[#allocation17_spill]] %s1951_s17  ;;  %s1597_s27 = smov [#allocation5]  }
  0x17   : > { %p1747_p10 = pnand %p1232_p7, %p408_p8  ;;  %s1954_s6 = sld [smem:[#allocation20_spill]] }
  0x18   : > { %s1955_s4 = sld [smem:[#allocation19_spill]]  ;;  %s444_s17 = sshll.u32 %s1597_s27, 4  ;;  %s445_s17 = int_to_ptr.vmem [resolvable:$true] %s444_s17 }
  0x19   : > { %p1335_p11 = pneg %p1747_p10  ;;  %s1598_s19 = smov 64  }
  0x1a   : > { %s1599_s20 = smov 4   ;;  %s1601_s24 = smov [#allocation7]  }
  0x1b   : > { %p1761_p12 = pnand %p1349_p9, %p1335_p11  ;;  %s461_s15 = sshll.u32 %s1601_s24, 4  ;;  %s462_s15 = int_to_ptr.vmem [resolvable:$true] %s461_s15 }
  0x1d   : > { %s442_s26 = sshll.u32 %s1954_s6, 4  ;;  %s1600_s6 = smov [#allocation2]   ;;  %s443_s26 = int_to_ptr.hbm [resolvable:$true] %s442_s26 }
  0x1e   : > { %s425_s30 = sshll.u32 %s1955_s4, 4  ;;  %s427_s21 = sshll.u32 %s1600_s6, 4  ;;  %s426_s30 = int_to_ptr.hbm [resolvable:$true] %s425_s30  ;;  %s428_s21 = int_to_ptr.vmem [resolvable:$true] %s427_s21 }
  0x1f   : > { %1341 = dma.hbm_to_vmem [thread:$0]  (!%p1761_p12), %s443_s26, 256, %s445_s17, [#allocation6], %s1598_s19, %s1598_s19, %s1599_s20  }
  0x20   : > { %s459_s4 = sshll.u32 %s1926_s8, 4  ;;  %512 = sbr.rel (%p1747_p10) target bundleno = 2311 (0x907), region = 84  ;;  %s460_s4 = int_to_ptr.hbm [resolvable:$true] %s459_s4 }
  0x21   : > { %1338 = dma.hbm_to_vmem [thread:$0]  (!%p1761_p12), %s426_s30, 256, %s428_s21, [#allocation3], %s1598_s19, %s1598_s19, %s1599_s20  }
  0x22   : > { %1344 = dma.hbm_to_vmem [thread:$0]  (!%p1761_p12), %s460_s4, 256, %s462_s15, [#allocation6], %s1598_s19, %s1598_s19, %s1599_s20  }
  0x25   : > { %1570 = dma.done.wait (%p1349_p9), [#allocation3], 256  }
  0x26   : > { %1572 = vsyncadd (%p1349_p9), [#allocation3], 4294967040 }
  0x27   : > { %1574 = dma.done.wait (%p1349_p9), [#allocation6], 512  }
  0x28   : > { %1576 = vsyncadd (%p1349_p9), [#allocation6], 4294966784  ;;  %p576_p13 = scmp.lt.s32.totalorder %s1719_s25, 1  ;;  %s1957_s23 = sld [smem:[#allocation18_spill]]  ;;  %v1310_v0 = vld [vmem:[%s1920_s2 + $0x8] sm:$0xff]  ;;  %v1309_v2 = vld [vmem:[%s1920_s2] sm:$0xff] }
  0x29   : > { %619 = vmatpush.bf16.msra.mxu0 %v1310_v0  ;;  %vm609_vm0 = vcmask 261120   ;;  %v1404_v6 = vld [vmem:[%s1921_s3] ss:$0 sm:$0xff]  ;;  %s1604_s15 = smov 80   ;;  %s1605_s21 = smov 72   ;;  %v1312_v13 = vld [vmem:[#allocation2 + $0x8] sm:$0xff] }
  0x2a   : > { %s577_s6 = scalar_select %p576_p13, %s1719_s25, 1  ;;  %656 = vmatpush.bf16.msra.mxu1 %v1312_v13  ;;  %v1311_v14 = vld [vmem:[#allocation2] sm:$0xff]  ;;  %vm670_vm1 = vcmask 64512   ;;  %vm705_vm2 = vcmask 1043456   ;;  %vm906_vm3 = vcmask 130048   ;;  %vm908_vm4 = vcmask 195584  }
  0x2b   : > { %s1608_s27 = smov 88   ;;  %v1405_v36 = vld [vmem:[%s1923_s5] ss:$0 sm:$0xff]  ;;  %s1609_s18 = smov 16   ;;  %vm1062_vm9 = vcmask 523264  }
  0x2c   : > { %s1242_s4 = sshll.u32 %s577_s6, 3  ;;  %s1602_s6 = smov 120  }
  0x2d   : > { %s583_s17 = scalar_lea.vmem %s1919_s1, %s1242_s4  ;;  %620 = vmatpush.bf16.msra.mxu0 %v1309_v2  ;;  %s1610_s26 = smov 8  }
  0x2e   : > { %s579_s24 = scalar_lea.vmem %s1957_s23, %s1242_s4  ;;  %v586_v3 = vld [vmem:[%s583_s17] sm:$0xff]  ;;  %s1603_s4 = smov 96   ;;  %657 = vmatpush.bf16.msra.mxu1 %v1311_v14 }
  0x2f   : > { %v1795_v1 = vld [vmem:[%s579_s24] sm:$0xff]  ;;  %s1606_s23 = smov 112   ;;  %s1607_s24 = smov 104  }
  0x30   : > { %v587_v4 = vadd.f32 %v586_v3, %v1795_v1  ;;  %v626_v15 = vpack.c.bf16 %v1795_v1, %v1795_v1  ;;  %s1611_s19 = smov 24  }
  0x32   : > { %v588_v5 = vpack.c.bf16 %v587_v4, %v587_v4  ;;  %1261 = vmatmul.msk.bf16.vlgmr.msra.gmra.mxu1 %vm609_vm0, %v626_v15 }
  0x34   : > { %1252 = vmatmul.msk.bf16.vlgmr.msra.gmra.mxu0 %vm609_vm0, %v588_v5 }
  0xaf   : > { %v659_v23 = vpop.f32.mrf.mxu1 }
  0xb0   : > { %v660_v37 = vadd.f32 %v1405_v36, %v659_v23 }
  0xb1   : > { %v622_v7 = vpop.f32.mrf.mxu0 }
  0xb2   : > { %v623_v8 = vadd.f32 %v1404_v6, %v622_v7  ;;  %v664_v38 = vpack.c.bf16 %v660_v37, %v660_v37 }
  0xb4   : > { %v663_v9 = vpack.c.bf16 %v623_v8, %v623_v8  ;;  %v707_v39 = vsel %vm705_vm2, %v664_v38, 0  ;;  %v758_v61 = vunpack.c.l.b16 %v664_v38 }
  0xb5   : > { %716 = vmatpush.bf16.msra.mxu3 %v707_v39 }
  0xb6   : > { %v666_v10 = vunpack.c.l.b16 %v663_v9  ;;  %v759_v62 = vpack.c.b16 %v758_v61, %v758_v61  ;;  %v1315_v61 = vld [vmem:[#allocation7] sm:$0xff] }
  0xb7   : > { %v661_v24 = vpop.f32.mrf.mxu1 }
  0xb8   : > { %v667_v11 = vpack.c.b16 %v666_v10, %v666_v10 }
  0xb9   : > { %v624_v12 = vpop.f32.mrf.mxu0 }
  0xba   : > { %722 = vrot.lane.b32.xlu2 %v667_v11, %s1602_s6  ;;  %668 = vrot.lane.b32.xlu0 %v667_v11, %s1603_s4 }
  0xc2   : > { %783 = vrot.lane.b32.xlu2 %v667_v11, %s1604_s15  ;;  %s1306_s15 = sshll.u32 %s1719_s25, 3 }
  0xc3   : > { %s1124_s30 = scalar_lea.hbm %s1934_s16, %s1306_s15 }
  0xc4   : > { %s1128_s20 = sshll.u32 %s1124_s30, 4  ;;  %s1129_s20 = int_to_ptr.hbm [resolvable:$true] %s1128_s20 }
  0xc5   : > { %s1539_s29 = sshra.s32 %s1129_s20, 4  ;;  %s1540_s29 = int_to_ptr.hbm [resolvable:$true] %s1539_s29 }
  0xc6   : > { %s1541_s15 = scalar_lea.hbm %s1540_s29, 8  ;;  %p1546_p3 = scmp.lt.s32.totalorder %s1540_s29, %s1934_s16 }
  0xc7   : > { %p1542_p0 = scmp.ne.s32.totalorder %s1540_s29, %s1541_s15 }
  0xc9   : > { %p1543_p1 = pnand %p1542_p0, %p1736_p5 }
  0xca   : > { %839 = vrot.lane.b32.xlu2 %v667_v11, %s1605_s21 }
  0xcb   : > { %p1544_p2 = pneg %p1543_p1 }
  0xd2   : > { %781 = vrot.lane.b32.xlu2 %v667_v11, %s1606_s23 }
  0xda   : > { %837 = vrot.lane.b32.xlu2 %v667_v11, %s1607_s24 }
 0x114   : > { %v723_v16 = vpop.permute.xlu2 %722 }
 0x11c   : > { %v784_v17 = vpop.permute.xlu2 %783 }
 0x11d   : > { %v789_v18 = vsel %vm670_vm1, %v784_v17, 0 }
 0x11e   : > { %798 = vmatpush.bf16.xpose.msrb.mxu1 %v789_v18 }
 0x124   : > { %v840_v19 = vpop.permute.xlu2 %839 }
 0x125   : > { %v845_v46 = vsel %vm670_vm1, %v840_v19, 0 }
 0x12c   : > { %v782_v20 = vpop.permute.xlu2 %781  ;;  %v669_v21 = vpop.permute.xlu0 %668 }
 0x12d   : > { %1266 = vmatmul.msk.bf16.vlgmr.msrb.gmra.mxu1 %vm670_vm1, %v782_v20  ;;  %v675_v22 = vsel %vm670_vm1, %v669_v21, 0 }
 0x12e   : > { %684 = vmatpush.bf16.xpose.msra.mxu2 %v675_v22 }
 0x134   : > { %v838_v47 = vpop.permute.xlu2 %837 }
 0x135   : > { %1262 = vmatmul.msk.bf16.vlgmr.msra.gmra.mxu2 %vm670_vm1, %v663_v9 }
 0x1aa   : > { %v800_v25 = vpop.f32.mrf.mxu1 }
 0x1ab   : > { %v804_v26 = vsel %vm670_vm1, %v800_v25, -inf }
 0x1ac   : > { %805 = vmax.xlane.f32.xlu2 %v804_v26 }
 0x1b2   : > { %v802_v27 = vpop.f32.mrf.mxu1 }
 0x1b8   : > { %v686_v28 = vpop.f32.mrf.mxu2 }
 0x1b9   : > { %v690_v29 = vsel %vm670_vm1, %v686_v28, -inf }
 0x1ba   : > { %691 = vmax.xlane.f32.xlu0 %v690_v29 }
 0x1c0   : > { %v688_v30 = vpop.f32.mrf.mxu2 }
 0x21f   : > { %v806_v50 = vpop.xlane.xlu2 %805 }
 0x220   : > { %v807_v51 = vsub.f32 %v800_v25, %v806_v50 }
 0x222   : > { %v808_v52 = vmul.f32 1.442695, %v807_v51 }
 0x22d   : > { %v692_v31 = vpop.xlane.xlu0 %691 }
 0x22e   : > { %v693_v32 = vsub.f32 %v686_v28, %v692_v31 }
 0x230   : > { %v694_v33 = vmul.f32 1.442695, %v693_v32 }
 0x232   : > { %1413 = vpow2.f32 %v694_v33 }
 0x238   : > { %v1414_v34 = vpop.eup %1413 }
 0x239   : > { %v696_v35 = vsel %vm670_vm1, %v1414_v34, 0.0 }
 0x23a   : > { %697 = vadd.xlane.f32.xlu1 %v696_v35  ;;  %v1313_v35 = vld [vmem:[#allocation5] sm:$0xff] }
 0x253   : > { %724 = vrot.lane.b32.xlu1 %v667_v11, %s1608_s27 }
 0x2ad   : > { %v698_v40 = vpop.xlane.xlu1 %697 }
 0x2ae   : > { %1415 = vrcp.f32 %v698_v40 }
 0x2af   : > { %1417 = vpow2.f32 %v808_v52 }
 0x2b4   : > { %v1416_v41 = vpop.eup %1415 }
 0x2b5   : > { %v700_v42 = vmul.f32 %v1416_v41, %v1414_v34  ;;  %v1418_v55 = vpop.eup %1417  ;;  %v1314_v34 = vld [vmem:[#allocation5 + $0x8] sm:$0xff] }
 0x2b6   : > { %v810_v57 = vsel %vm670_vm1, %v1418_v55, 0.0  ;;  %940 = vmatpush.bf16.msra.mxu1 %v1314_v34 }
 0x2b7   : > { %v701_v43 = vpack.c.bf16 %v700_v42, %v700_v42 }
 0x2b9   : > { %1263 = vmatmul.msk.bf16.vlgmr.msra.gmra.mxu3 %vm670_vm1, %v701_v43  ;;  %v1406_v43 = vld [vmem:[%s1925_s7] ss:$0 sm:$0xff] }
 0x2ba   : > { %941 = vmatpush.bf16.msra.mxu1 %v1313_v35 }
 0x2c5   : > { %v725_v44 = vpop.permute.xlu1 %724 }
 0x2c6   : > { %v730_v45 = vsel %vm670_vm1, %v725_v44, 0 }
 0x2c7   : > { %739 = vmatpush.bf16.xpose.msrb.mxu3 %v730_v45 }
 0x2ce   : > { %1264 = vmatmul.msk.bf16.vlgmr.msrb.gmra.mxu3 %vm670_vm1, %v723_v16 }
 0x2cf   : > { %854 = vmatpush.bf16.xpose.msra.mxu3 %v845_v46 }
 0x2de   : > { %1268 = vmatmul.msk.bf16.vlgmr.msra.gmra.mxu3 %vm670_vm1, %v838_v47 }
 0x33c   : > { %v1827_v48 = vpop.f32.mrf.mxu3 }
 0x344   : > { %v720_v49 = vpop.f32.mrf.mxu3 }
 0x345   : > { %v1612_v49 = vmov 32.0  }
 0x351   : > { %v741_v53 = vpop.f32.mrf.mxu3 }
 0x352   : > { %v745_v54 = vsel %vm670_vm1, %v741_v53, -inf }
 0x353   : > { %746 = vmax.xlane.f32.xlu1 %v745_v54 }
 0x359   : > { %v743_v56 = vpop.f32.mrf.mxu3 }
 0x35b   : > { %811 = vadd.xlane.f32.xlu1 %v810_v57 }
 0x361   : > { %v856_v58 = vpop.f32.mrf.mxu3 }
 0x362   : > { %v860_v59 = vsel %vm670_vm1, %v856_v58, -inf }
 0x363   : > { %861 = vmax.xlane.f32.xlu0 %v860_v59 }
 0x369   : > { %v858_v60 = vpop.f32.mrf.mxu3 }
 0x374   : > { %816 = vrot.lane.b32.xlu1 %v759_v62, %s1606_s23 }
 0x377   : > { %760 = vrot.lane.b32.xlu0 %v759_v62, %s1602_s6  ;;  %s573_s6 = sand.u32 1, %s1587_s22  }
 0x378   : > { %s1241_s4 = sshll.u32 %s573_s6, 3  ;;  %s1114_s28 = scalar_lea.sflag [#allocation4], %s573_s6 }
 0x3c6   : > { %v747_v63 = vpop.xlane.xlu1 %746 }
 0x3c7   : > { %v748_v0 = vsub.f32 %v741_v53, %v747_v63 }
 0x3c9   : > { %v749_v2 = vmul.f32 1.442695, %v748_v0 }
 0x3cb   : > { %1419 = vpow2.f32 %v749_v2  ;;  %v1319_v2 = vld [vmem:[%s1928_s10 + $0x10] sm:$0xff] }
 0x3ce   : > { %v812_v7 = vpop.xlane.xlu1 %811 }
 0x3d1   : > { %v1420_v3 = vpop.eup %1419 }
 0x3d2   : > { %v751_v4 = vsel %vm670_vm1, %v1420_v3, 0.0 }
 0x3d3   : > { %752 = vadd.xlane.f32.xlu0 %v751_v4 }
 0x3d6   : > { %v862_v5 = vpop.xlane.xlu0 %861 }
 0x3d7   : > { %v863_v6 = vsub.f32 %v856_v58, %v862_v5 }
 0x3d9   : > { %v864_v8 = vmul.f32 1.442695, %v863_v6 }
 0x3db   : > { %1421 = vpow2.f32 %v864_v8 }
 0x3dc   : > { %1423 = vrcp.f32 %v812_v7 }
 0x3e1   : > { %v1422_v9 = vpop.eup %1421 }
 0x3e2   : > { %v1424_v10 = vpop.eup %1423  ;;  %v866_v11 = vsel %vm670_vm1, %v1422_v9, 0.0 }
 0x3e3   : > { %867 = vadd.xlane.f32.xlu2 %v866_v11  ;;  %v814_v12 = vmul.f32 %v1424_v10, %v1418_v55  ;;  %v1407_v10 = vld [vmem:[%s1930_s12] ss:$0 sm:$0xff] }
 0x3e5   : > { %v815_v16 = vpack.c.bf16 %v814_v12, %v814_v12  ;;  %v1408_v12 = vld [vmem:[%s1931_s13] ss:$0 sm:$0xff] }
 0x3e6   : > { %v817_v13 = vpop.permute.xlu1 %816 }
 0x3e7   : > { %872 = vrot.lane.b32.xlu0 %v759_v62, %s1607_s24  ;;  %v822_v14 = vsel %vm705_vm2, %v817_v13, 0  ;;  %v1320_v62 = vld [vmem:[%s1928_s10 + $0x18] sm:$0xff] }
 0x3e8   : > { %831 = vmatpush.bf16.msrb.mxu2 %v822_v14  ;;  %1070 = vmatpush.bf16.msrb.mxu3 %v1320_v62 }
 0x3e9   : > { %v761_v15 = vpop.permute.xlu0 %760 }
 0x3ea   : > { %v766_v17 = vsel %vm705_vm2, %v761_v15, 0 }
 0x3eb   : > { %775 = vmatpush.bf16.msrb.mxu0 %v766_v17  ;;  %1267 = vmatmul.msk.bf16.vlgmr.msrb.gmra.mxu2 %vm670_vm1, %v815_v16  ;;  %v1318_v17 = vld [vmem:[%s1928_s10 + $0x8] sm:$0xff] }
 0x3ec   : > { %1071 = vmatpush.bf16.msrb.mxu3 %v1319_v2 }
 0x3f0   : > { %1072 = vmatpush.bf16.msrb.mxu3 %v1318_v17 }
 0x446   : > { %v753_v18 = vpop.xlane.xlu0 %752 }
 0x447   : > { %1425 = vrcp.f32 %v753_v18  ;;  %v1317_v18 = vld [vmem:[%s1928_s10] sm:$0xff] }
 0x448   : > { %1073 = vmatpush.bf16.msrb.mxu3 %v1317_v18 }
 0x44d   : > { %v1426_v19 = vpop.eup %1425 }
 0x44e   : > { %v755_v20 = vmul.f32 %v1426_v19, %v1420_v3  ;;  %v1409_v19 = vld [vmem:[%s1927_s9] ss:$0 sm:$0xff] }
 0x450   : > { %v756_v21 = vpack.c.bf16 %v755_v20, %v755_v20 }
 0x452   : > { %1265 = vmatmul.msk.bf16.vlgmr.msrb.gmra.mxu0 %vm670_vm1, %v756_v21 }
 0x456   : > { %v868_v22 = vpop.xlane.xlu2 %867 }
 0x457   : > { %1427 = vrcp.f32 %v868_v22 }
 0x458   : > { %1429 = vrcp.f32 %v1612_v49 }
 0x459   : > { %v873_v23 = vpop.permute.xlu0 %872 }
 0x45a   : > { %v878_v24 = vsel %vm705_vm2, %v873_v23, 0 }
 0x45b   : > { %887 = vmatpush.bf16.msra.mxu0 %v878_v24 }
 0x45d   : > { %v1428_v25 = vpop.eup %1427 }
 0x45e   : > { %v870_v26 = vmul.f32 %v1428_v25, %v1422_v9  ;;  %v1430_v50 = vpop.eup %1429  ;;  %v1410_v25 = vld [vmem:[%s1929_s11] ss:$0 sm:$0xff] }
 0x45f   : > { %v954_v51 = vmul.f32 32.0, %v1430_v50  ;;  %vm958_vm5 = vweird.f32 %v1430_v50 }
 0x460   : > { %v871_v27 = vpack.c.bf16 %v870_v26, %v870_v26 }
 0x461   : > { %v955_v52 = vsub.f32 1.0, %v954_v51 }
 0x462   : > { %1269 = vmatmul.msk.bf16.vlgmr.msra.gmra.mxu0 %vm670_vm1, %v871_v27 }
 0x463   : > { %v956_v53 = vmul.f32 %v1430_v50, %v955_v52 }
 0x465   : > { %v957_v54 = vadd.f32 %v1430_v50, %v956_v53 }
 0x467   : > { %v959_v55 = vsel %vm958_vm5, %v1430_v50, %v957_v54 }
 0x46e   : > { %v833_v28 = vpop.f32.mrf.mxu2 }
 0x46f   : > { %898 = vrot.lane.b32.xlu0 %v833_v28, %s1609_s18 }
 0x476   : > { %v835_v29 = vpop.f32.mrf.mxu2 }
 0x4cf   : > { %v777_v30 = vpop.f32.mrf.mxu0 }
 0x4d0   : > { %894 = vrot.lane.b32.xlu2 %v777_v30, %s1610_s26  ;;  %s1958_s26 = sld [smem:[#allocation21_spill]] }
 0x4d7   : > { %v779_v31 = vpop.f32.mrf.mxu0 }
 0x4df   : > { %v889_v32 = vpop.f32.mrf.mxu0 }
 0x4e0   : > { %902 = vrot.lane.b32.xlu0 %v889_v32, %s1611_s19  ;;  %s575_s19 = scalar_lea.vmem [#allocation8], %s1241_s4  ;;  %s1545_s4 = scalar_lea.hbm %s1934_s16, 16 }
 0x4e1   : > { %v899_v36 = vpop.permute.xlu0 %898  ;;  %s1126_s25 = sshll.u32 %s575_s19, 4  ;;  %p1547_p4 = scmp.lt.s32.totalorder %s1545_s4, %s1541_s15  ;;  %s1127_s25 = int_to_ptr.vmem [resolvable:$true] %s1126_s25 }
 0x4e3   : > { %p1548_p7 = por %p1547_p4, %p1546_p3 }
 0x4e5   : > { %p1549_p8 = pnand %p1548_p7, %p1544_p2 }
 0x4e7   : > { %v891_v33 = vpop.f32.mrf.mxu0 }
 0x52a   : > { %v895_v37 = vpop.permute.xlu2 %894 }
 0x52b   : > { %v905_v38 = vsel %vm670_vm1, %v1827_v48, %v895_v37 }
 0x52c   : > { %v907_v39 = vsel %vm906_vm3, %v905_v38, %v899_v36 }
 0x552   : > { %v903_v40 = vpop.permute.xlu0 %902 }
 0x553   : > { %v909_v41 = vsel %vm908_vm4, %v907_v39, %v903_v40 }
 0x554   : > { %v910_v42 = vpack.c.bf16 %v909_v41, %v909_v41 }
 0x556   : > { %1278 = vmatmul.msk.bf16.vlgmr.msra.gmra.mxu1 %vm609_vm0, %v910_v42 }
 0x5d3   : > { %v943_v44 = vpop.f32.mrf.mxu1 }
 0x5d4   : > { %v944_v45 = vadd.f32 %v1406_v43, %v943_v44 }
 0x5d6   : > { %v947_v46 = vadd.f32 %v944_v45, %v1795_v1  ;;  %v1316_v1 = vld [vmem:[#allocation7 + $0x8] sm:$0xff]  ;;  %v1411_v45 = vld [vmem:[%s1932_s14] ss:$0 sm:$0xff] }
 0x5d7   : > { %1017 = vmatpush.bf16.msra.mxu2 %v1316_v1 }
 0x5d8   : > { %v950_v47 = vsel %vm609_vm0, %v947_v46, 0.0 }
 0x5d9   : > { %951 = vadd.xlane.f32.xlu1 %v950_v47 }
 0x5db   : > { %v945_v48 = vpop.f32.mrf.mxu1  ;;  %1018 = vmatpush.bf16.msra.mxu2 %v1315_v61 }
 0x5dc   : > { %v1412_v48 = vld [vmem:[%s1958_s26] ss:$0 sm:$0xff] }
 0x64c   : > { %v952_v56 = vpop.xlane.xlu1 %951 }
 0x64d   : > { %v960_v57 = vmul.f32 %v959_v55, %v952_v56 }
 0x64f   : > { %v961_v58 = vsub.f32 %v947_v46, %v960_v57 }
 0x651   : > { %v962_v59 = vmul.f32 %v961_v58, %v961_v58 }
 0x653   : > { %v963_v60 = vsel %vm609_vm0, %v962_v59, 0.0 }
 0x654   : > { %964 = vadd.xlane.f32.xlu0 %v963_v60 }
 0x6c7   : > { %v965_v63 = vpop.xlane.xlu0 %964 }
 0x6c8   : > { %v966_v0 = vmul.f32 %v965_v63, %v959_v55 }
 0x6ca   : > { %v967_v3 = vadd.f32 1e-05, %v966_v0 }
 0x6cc   : > { %1431 = vrsqrt.f32 %v967_v3  ;;  %vm974_vm7 = vweird.f32 %v967_v3 }
 0x6d2   : > { %v1432_v4 = vpop.eup %1431 }
 0x6d3   : > { %v969_v5 = vmul.f32 %v1432_v4, %v967_v3  ;;  %vm975_vm6 = vweird.f32 %v1432_v4 }
 0x6d4   : > { %vm976_vm8 = vmor %vm974_vm7, %vm975_vm6 }
 0x6d5   : > { %v970_v6 = vmul.f32 %v1432_v4, %v969_v5 }
 0x6d7   : > { %v971_v7 = vmul.f32 0.5, %v970_v6 }
 0x6d9   : > { %v972_v8 = vsub.f32 1.5, %v971_v7 }
 0x6db   : > { %v973_v9 = vmul.f32 %v1432_v4, %v972_v8 }
 0x6dd   : > { %v977_v11 = vsel %vm976_vm8, %v1432_v4, %v973_v9 }
 0x6de   : > { %v978_v13 = vmul.f32 %v977_v11, %v961_v58 }
 0x6e0   : > { %v982_v14 = vmul.f32 %v1407_v10, %v978_v13 }
 0x6e2   : > { %v986_v15 = vadd.f32 %v1408_v12, %v982_v14 }
 0x6e4   : > { %v987_v16 = vpack.c.bf16 %v986_v15, %v986_v15 }
 0x6e6   : > { %1287 = vmatmul.msk.bf16.vlgmr.msra.gmra.mxu2 %vm609_vm0, %v987_v16 }
 0x769   : > { %v1020_v20 = vpop.f32.mrf.mxu2 }
 0x76a   : > { %v1021_v21 = vadd.f32 %v1409_v19, %v1020_v20 }
 0x76c   : > { %v1024_v22 = vmax.f32 %v1021_v21, 0.0 }
 0x76e   : > { %v1025_v23 = vpack.c.bf16 %v1024_v22, %v1024_v22 }
 0x770   : > { %1304 = vmatmul.msk.bf16.vlgmr.msrb.gmra.mxu3 %vm1062_vm9, %v1025_v23 }
 0x771   : > { %v1022_v24 = vpop.f32.mrf.mxu2 }
 0x7f3   : > { %v1075_v26 = vpop.f32.mrf.mxu3 }
 0x7f4   : > { %v1076_v27 = vadd.f32 %v1410_v25, %v1075_v26 }
 0x7f6   : > { %v1079_v28 = vadd.f32 %v1076_v27, %v986_v15 }
 0x7f8   : > { %v1082_v29 = vsel %vm609_vm0, %v1079_v28, 0.0 }
 0x7f9   : > { %1083 = vadd.xlane.f32.xlu2 %v1082_v29 }
 0x7fb   : > { %v1077_v30 = vpop.f32.mrf.mxu3 }
 0x86c   : > { %v1084_v31 = vpop.xlane.xlu2 %1083 }
 0x86d   : > { %v1085_v32 = vmul.f32 %v1084_v31, %v959_v55 }
 0x86f   : > { %v1086_v33 = vsub.f32 %v1079_v28, %v1085_v32 }
 0x871   : > { %v1087_v34 = vmul.f32 %v1086_v33, %v1086_v33 }
 0x873   : > { %v1088_v35 = vsel %vm609_vm0, %v1087_v34, 0.0 }
 0x874   : > { %1089 = vadd.xlane.f32.xlu1 %v1088_v35 }
 0x8e7   : > { %v1090_v36 = vpop.xlane.xlu1 %1089 }
 0x8e8   : > { %v1091_v37 = vmul.f32 %v1090_v36, %v959_v55 }
 0x8ea   : > { %v1092_v38 = vadd.f32 1e-05, %v1091_v37 }
 0x8ec   : > { %1433 = vrsqrt.f32 %v1092_v38  ;;  %vm1099_vm11 = vweird.f32 %v1092_v38 }
 0x8f2   : > { %v1434_v39 = vpop.eup %1433 }
 0x8f3   : > { %v1094_v40 = vmul.f32 %v1434_v39, %v1092_v38  ;;  %vm1100_vm10 = vweird.f32 %v1434_v39 }
 0x8f4   : > { %vm1101_vm12 = vmor %vm1099_vm11, %vm1100_vm10 }
 0x8f5   : > { %v1095_v41 = vmul.f32 %v1434_v39, %v1094_v40 }
 0x8f7   : > { %v1096_v42 = vmul.f32 0.5, %v1095_v41 }
 0x8f9   : > { %v1097_v43 = vsub.f32 1.5, %v1096_v42 }
 0x8fb   : > { %v1098_v44 = vmul.f32 %v1434_v39, %v1097_v43 }
 0x8fd   : > { %v1102_v46 = vsel %vm1101_vm12, %v1434_v39, %v1098_v44 }
 0x8fe   : > { %v1103_v47 = vmul.f32 %v1102_v46, %v1086_v33 }
 0x900   : > { %v1107_v49 = vmul.f32 %v1411_v45, %v1103_v47 }
 0x902   : > { %v1111_v50 = vadd.f32 %v1412_v48, %v1107_v49 }
 0x904   : > { %1112 = vst.msk [vmem:[%s575_s19] sm:$0xff] %vm609_vm0, %v1111_v50 }
 0x905   : > { %1552 = shalt.err (!%p1549_p8)
}
 0x906   : > { %1333 = dma.vmem_to_hbm [thread:$0]  (%p1736_p5), %s1127_s25, 128, %s1129_s20, %s1114_s28  }
 0x907 PF: > { %s1959_s6 = sld [smem:[#allocation14_spill]] }
 0x908   : > { %s1960_s30 = sld [smem:[#allocation12_spill]] }
 0x90d   : > { %p1355_p9 = scmp.ge.s32.totalorder %s1959_s6, 2 }
 0x90e   : > { %s1140_s18 = sand.u32 1, %s1960_s30  }
 0x90f   : > { %p1346_p10 = pnand %p1355_p9, %p1740_p6  ;;  %s1141_s26 = scalar_lea.sflag [#allocation4], %s1140_s18 }
 0x911   : > { %p1347_p11 = pneg %p1346_p10 }
 0x913   : > { %1578 = dma.done.wait (%p1347_p11), %s1141_s26, 128  }
 0x914   : > { %1580 = vsyncadd (%p1347_p11), %s1141_s26, 4294967168  ;;  %s1962_s24 = sld [smem:[#allocation15_spill]]  ;;  %s1965_s21 = smov %s1587_s22 }
 0x915   : > { %s1963_s19 = sld [smem:[#allocation13_spill]] }
 0x916   : > { %s1964_s23 = sld [smem:[#allocation16_spill]] }
 0x91a   : > { %p28_p12 = scmp.ge.s32.totalorder %s1962_s24, 4  }
 0x91b   : > { %s1966_s22 = smov %s1963_s19 }
 0x91c   :  { %30 = sbr.rel (!%p28_p12) target bundleno = 10 (0xa), region = 135 }
 0x921   :  { %1147 = vsyncpa [#allocation3], 1 }
 0x922   :  { %1149 = vsyncpa [#allocation3 + $0x1], 1 }
 0x923   :  { %1150 = vsyncpa [#allocation6], 1 }
 0x924   :  { %1151 = vsyncpa [#allocation4], 1 }
 0x925   :  { %1153 = vsyncpa [#allocation4 + $0x1], 1 }

</bundles_post_ra>
